<compile_context>
chip_gen: v5e
topology: v5e:2x2
jax: 0.10.0
libtpu: 0.0.40
codegen_flags: <defaults>
</compile_context>

<pallas_src>
import functools

import jax
import jax.numpy as jnp
from jax.experimental import pallas as pl
from jax.experimental.pallas import tpu as pltpu


# ----------------------------- Pallas kernel ------------------------------------
def _matmul_bias_relu_kernel(w_ref, c_ref, b_ref, o_ref):
    # w_ref: (1, Cout, K) bf16   c_ref: (1, K, TM) bf16
    # b_ref: (1, Cout, 1) f32    o_ref: (1, Cout, TM) f32
    acc = jax.lax.dot_general(
        w_ref[0], c_ref[0],
        dimension_numbers=(((1,), (0,)), ((), ())),
        preferred_element_type=jnp.float32)
    o_ref[0] = jnp.maximum(acc + b_ref[0], 0.0).astype(o_ref.dtype)


def _batched_matmul_bias_relu(w, cols, b, *, tm=512):
    """w: (G, Cout, K), cols: (G, K, M), b: (G, Cout) -> (G, Cout, M) f32.

    Output block is (Cout, tm): M (large) is the lane dimension -> lane-dense.
    Branch axis G is a parallel grid axis (one pallas_call for both branches).
    """
    G, Cout, K = w.shape
    M = cols.shape[2]

    w = w.astype(jnp.bfloat16)
    cols = cols.astype(jnp.bfloat16)
    b2 = b.astype(jnp.float32).reshape(G, Cout, 1)

    if M <= tm:
        bm, Mp = M, M                       # single full-extent block
    else:
        bm = tm
        Mp = pl.cdiv(M, tm) * tm
        if Mp != M:                         # never taken for the shapes used here
            cols = jnp.pad(cols, ((0, 0), (0, 0), (0, Mp - M)))

    out = pl.pallas_call(
        _matmul_bias_relu_kernel,
        out_shape=jax.ShapeDtypeStruct((G, Cout, Mp), jnp.float32),
        grid=(G, Mp // bm),
        in_specs=[
            pl.BlockSpec((1, Cout, K), lambda g, m: (g, 0, 0)),
            pl.BlockSpec((1, K, bm), lambda g, m: (g, 0, m)),
            pl.BlockSpec((1, Cout, 1), lambda g, m: (g, 0, 0)),
        ],
        out_specs=pl.BlockSpec((1, Cout, bm), lambda g, m: (g, 0, m)),
        compiler_params=pltpu.CompilerParams(
            dimension_semantics=("parallel", "parallel")),
    )(w, cols, b2)
    return out if Mp == M else out[:, :, :M]


# ----------------------------- im2col glue (plain JAX, GCNHW layout) -------------
def _im2col_gcnhw(x, kh, kw, stride, pad):
    """x: (G, C, N, H, W) -> cols (G, C*kh*kw, N*Ho*Wo), Ho, Wo.

    K ordering is (ci, i, j), matching reshaped OIHW weights."""
    G, C, N, H, W = x.shape
    xp = jnp.pad(x, ((0, 0), (0, 0), (0, 0), (pad, pad), (pad, pad)))
    Ho = (H + 2 * pad - kh) // stride + 1
    Wo = (W + 2 * pad - kw) // stride + 1
    patches = []
    for i in range(kh):
        for j in range(kw):
            patches.append(
                xp[:, :, :, i:i + stride * (Ho - 1) + 1:stride,
                            j:j + stride * (Wo - 1) + 1:stride])   # (G,C,N,Ho,Wo)
    col = jnp.stack(patches, axis=2)                  # (G, C, kh*kw, N, Ho, Wo)
    return col.reshape(G, C * kh * kw, N * Ho * Wo), Ho, Wo


# ----------------------------- conv / conv-transpose layers ----------------------
def conv2d_relu(x, w, b, stride, pad, *, tm=512):
    """PyTorch Conv2d + ReLU, both branches at once.
    x: (G, Cin, N, H, W), w: (G, Cout, Cin, kh, kw), b: (G, Cout)."""
    G, Cout, Cin, kh, kw = w.shape
    N = x.shape[2]
    cols, Ho, Wo = _im2col_gcnhw(x, kh, kw, stride, pad)
    wm = w.reshape(G, Cout, Cin * kh * kw)
    out = _batched_matmul_bias_relu(wm, cols, b, tm=tm)     # (G, Cout, N*Ho*Wo)
    return out.reshape(G, Cout, N, Ho, Wo)


def conv_transpose2d_s1_relu(x, w, b, pad, *, tm=512):
    """PyTorch ConvTranspose2d(stride=1) + ReLU.  w: (G, Cin, Cout, kh, kw)."""
    kh = w.shape[3]
    w_conv = jnp.flip(w, axis=(3, 4)).transpose(0, 2, 1, 3, 4)   # (G,Cout,Cin,kh,kw)
    return conv2d_relu(x, w_conv, b, stride=1, pad=kh - 1 - pad, tm=tm)


def conv_transpose2d_s2_relu(x, w, b, *, tm=512):
    """PyTorch ConvTranspose2d(kernel=4, stride=2, padding=1) + ReLU via sub-pixel
    decomposition.  x: (G, Cin, N, H, W), w: (G, Cin, Cout, 4, 4), b: (G, Cout).

    The 4 output phases y[2q+rh, 2r+rw] only touch a 2x2 window of the un-dilated
    input; all four are packed into one (4*Cout, Cin*9) matmul over a stride-1
    3x3 im2col of pad(x, 1), then pixel-shuffled back to (2H, 2W)."""
    G, Cin, N, H, W = x.shape
    Cout = w.shape[2]
    assert w.shape[3] == 4 and w.shape[4] == 4

    # Equivalent-conv kernel: flip spatially, swap in/out channels.
    wc = jnp.flip(w, axis=(3, 4)).transpose(0, 2, 1, 3, 4)   # (G, Cout, Cin, 4, 4)

    # Per-phase 3x3 taps (1D pattern, applied separably in h and w):
    #   even phase: offset 0 -> wc row 0, offset 1 -> wc row 2
    #   odd  phase: offset 1 -> wc row 1, offset 2 -> wc row 3
    tap = {0: ((0, 0), (1, 2)), 1: ((1, 1), (2, 3))}
    W3 = jnp.zeros((G, 2, 2, Cout, Cin, 3, 3), wc.dtype)
    for rh in (0, 1):
        for rw in (0, 1):
            for (u, a) in tap[rh]:
                for (v, c) in tap[rw]:
                    W3 = W3.at[:, rh, rw, :, :, u, v].set(wc[:, :, :, a, c])
    W3 = W3.reshape(G, 4 * Cout, Cin * 9)
    b4 = jnp.tile(b, (1, 4))                                  # (G, 4*Cout)

    cols, Ho, Wo = _im2col_gcnhw(x, 3, 3, 1, 1)               # Ho=H, Wo=W
    out = _batched_matmul_bias_relu(W3, cols, b4, tm=tm)      # (G, 4*Cout, N*H*W)

    out = out.reshape(G, 2, 2, Cout, N, H, W)
    out = out.transpose(0, 3, 4, 5, 1, 6, 2)                  # (G,Cout,N,H,2,W,2)
    return out.reshape(G, Cout, N, 2 * H, 2 * W)


# ----------------------------- parameter construction ----------------------------
def _make_params(key):
    """Synthetic parameters matching Networks.__init__ shapes; branch-stacked on axis 0."""
    def conv_p(k, cout, cin, ks):
        k1, k2 = jax.random.split(k)
        w = 0.1 * jax.random.normal(k1, (2, cout, cin, ks, ks), jnp.float32)
        b = 0.1 * jax.random.normal(k2, (2, cout), jnp.float32)
        return w, b

    def convT_p(k, cin, cout, ks):
        k1, k2 = jax.random.split(k)
        w = 0.1 * jax.random.normal(k1, (2, cin, cout, ks, ks), jnp.float32)
        b = 0.1 * jax.random.normal(k2, (2, cout), jnp.float32)
        return w, b

    keys = jax.random.split(key, 6)
    return {
        "enc1": conv_p(keys[0], 10, 1, 4),
        "enc2": conv_p(keys[1], 20, 10, 3),
        "enc3": conv_p(keys[2], 30, 20, 4),
        "dec1": convT_p(keys[3], 30, 20, 4),
        "dec2": convT_p(keys[4], 20, 10, 3),
        "dec3": convT_p(keys[5], 10, 1, 4),
    }
    # NOTE: self.weight / self.weightd* (train_num x train_num) are unused in forward().


# ----------------------------- Networks.forward ----------------------------------
def networks_forward(params, input1, input2, *, tm=512):
    # Stack both branches: (G=2, C, N, H, W) internal layout (C=1 -> trivial transpose).
    x = jnp.stack([input1, input2], axis=0)          # (2, N, 1, H, W)
    x = jnp.transpose(x, (0, 2, 1, 3, 4))            # (2, 1, N, H, W)

    x = conv2d_relu(x, *params["enc1"], stride=2, pad=1, tm=tm)
    x = conv2d_relu(x, *params["enc2"], stride=1, pad=1, tm=tm)
    x = conv2d_relu(x, *params["enc3"], stride=2, pad=1, tm=tm)
    x = conv_transpose2d_s2_relu(x, *params["dec1"], tm=tm)
    x = conv_transpose2d_s1_relu(x, *params["dec2"], pad=1, tm=tm)
    x = conv_transpose2d_s2_relu(x, *params["dec3"], tm=tm)

    out = jnp.transpose(x, (0, 2, 1, 3, 4))          # (2, N, 1, H, W)
    return out[0], out[1]


# ----------------------------- reference (pure lax) for validation ----------------
# Reference uses the same bf16-operand / f32-accumulation numerics as the kernel.
def _ref_conv(x, w, b, stride, pad):
    y = jax.lax.conv_general_dilated(
        x.astype(jnp.bfloat16), w.astype(jnp.bfloat16),
        (stride, stride), [(pad, pad), (pad, pad)],
        dimension_numbers=("NCHW", "OIHW", "NCHW"),
        preferred_element_type=jnp.float32)
    return jax.nn.relu(y + b[None, :, None, None])


def _ref_convT(x, w, b, stride, pad):
    kh = w.shape[2]
    w_conv = jnp.flip(w, (2, 3)).transpose(1, 0, 2, 3)
    y = jax.lax.conv_general_dilated(
        x.astype(jnp.bfloat16), w_conv.astype(jnp.bfloat16),
        (1, 1), [(kh - 1 - pad,) * 2] * 2,
        lhs_dilation=(stride, stride),
        dimension_numbers=("NCHW", "OIHW", "NCHW"),
        preferred_element_type=jnp.float32)
    return jax.nn.relu(y + b[None, :, None, None])


def _ref_forward(params, input1, input2):
    def branch(x, g):
        x = _ref_conv(x, params["enc1"][0][g], params["enc1"][1][g], 2, 1)
        x = _ref_conv(x, params["enc2"][0][g], params["enc2"][1][g], 1, 1)
        x = _ref_conv(x, params["enc3"][0][g], params["enc3"][1][g], 2, 1)
        x = _ref_convT(x, params["dec1"][0][g], params["dec1"][1][g], 2, 1)
        x = _ref_convT(x, params["dec2"][0][g], params["dec2"][1][g], 1, 1)
        x = _ref_convT(x, params["dec3"][0][g], params["dec3"][1][g], 2, 1)
        return x
    return branch(input1, 0), branch(input2, 1)


# ----------------------------- main -----------------------------------------------
if __name__ == "__main__":
    key = jax.random.PRNGKey(0)
    kp, k1, k2 = jax.random.split(key, 3)
    params = _make_params(kp)

    # small stand-in for the (train_num, 1, 128, 128) training batch
    input1 = jax.random.normal(k1, (2, 1, 16, 16), jnp.float32)
    input2 = jax.random.normal(k2, (2, 1, 16, 16), jnp.float32)

    fwd = jax.jit(functools.partial(networks_forward, params))
    out1, out2 = fwd(input1, input2)
    jax.block_until_ready((out1, out2))

    ref1, ref2 = _ref_forward(params, input1, input2)
    assert out1.shape == (2, 1, 16, 16) and out2.shape == (2, 1, 16, 16)
    assert jnp.allclose(out1, ref1, atol=2e-2, rtol=2e-2)
    assert jnp.allclose(out2, ref2, atol=2e-2, rtol=2e-2)

    print("KERNEL_OK")
</pallas_src>

<mosaic_0001>
module attributes {stable_mosaic.version = 11 : i64} {
  func.func @_matmul_bias_relu_kernel(%arg0: i32, %arg1: i32, %arg2: memref<1x10x16xbf16, #tpu.memory_space<vmem>>, %arg3: memref<1x16x128xbf16, #tpu.memory_space<vmem>>, %arg4: memref<1x10x1xf32, #tpu.memory_space<vmem>>, %arg5: memref<1x10x128xf32, #tpu.memory_space<vmem>>) attributes {dimension_semantics = [#tpu.dimension_semantics<parallel>, #tpu.dimension_semantics<parallel>], iteration_bounds = array<i64: 2, 1>, scalar_prefetch = 0 : i64, scratch_operands = 0 : i64, tpu.core_type = #tpu.core_type<tc>, window_params = [{transform_indices = @transform_0, window_bounds = array<i64: 1, 10, 16>}, {transform_indices = @transform_1, window_bounds = array<i64: 1, 16, 128>}, {transform_indices = @transform_2, window_bounds = array<i64: 1, 10, 1>}, {transform_indices = @transform_3, window_bounds = array<i64: 1, 10, 128>}]} {
    %c0 = arith.constant 0 : index
    %c0_0 = arith.constant 0 : index
    %c0_1 = arith.constant 0 : index
    %0 = vector.load %arg2[%c0, %c0_0, %c0_1] : memref<1x10x16xbf16, #tpu.memory_space<vmem>>, vector<1x10x16xbf16>
    %1 = vector.shape_cast %0 : vector<1x10x16xbf16> to vector<10x16xbf16>
    %c0_2 = arith.constant 0 : index
    %c0_3 = arith.constant 0 : index
    %c0_4 = arith.constant 0 : index
    %2 = vector.load %arg3[%c0_2, %c0_3, %c0_4] : memref<1x16x128xbf16, #tpu.memory_space<vmem>>, vector<1x16x128xbf16>
    %3 = vector.shape_cast %2 : vector<1x16x128xbf16> to vector<16x128xbf16>
    %cst = arith.constant dense<0.000000e+00> : vector<10x128xf32>
    %4 = tpu.matmul %1, %3, %cst {dimension_numbers = #tpu.dot_dimension_numbers<[1], [0], [0], [1], [0, 0, 1, 1], [], []>} : vector<10x16xbf16>, vector<16x128xbf16>, vector<10x128xf32> -> vector<10x128xf32>
    %c0_5 = arith.constant 0 : index
    %c0_6 = arith.constant 0 : index
    %c0_7 = arith.constant 0 : index
    %5 = vector.load %arg4[%c0_5, %c0_6, %c0_7] : memref<1x10x1xf32, #tpu.memory_space<vmem>>, vector<1x10x1xf32>
    %6 = vector.shape_cast %5 : vector<1x10x1xf32> to vector<10x1xf32>
    %7 = vector.broadcast %6 : vector<10x1xf32> to vector<10x128xf32>
    %8 = arith.addf %4, %7 : vector<10x128xf32>
    %cst_8 = arith.constant 0.000000e+00 : f32
    %9 = vector.broadcast %cst_8 : f32 to vector<10x128xf32>
    %10 = arith.maximumf %8, %9 : vector<10x128xf32>
    %c0_9 = arith.constant 0 : index
    %c0_10 = arith.constant 0 : index
    %c0_11 = arith.constant 0 : index
    %11 = vector.load %arg5[%c0_9, %c0_10, %c0_11] : memref<1x10x128xf32, #tpu.memory_space<vmem>>, vector<1x10x128xf32>
    %12 = vector.shape_cast %11 : vector<1x10x128xf32> to vector<10x128xf32>
    %13 = vector.shape_cast %10 : vector<10x128xf32> to vector<1x10x128xf32>
    tpu.vector_store %arg5[%c0_9, %c0_10, %c0_11], %13 {strides = array<i32>} : memref<1x10x128xf32, #tpu.memory_space<vmem>>, vector<1x10x128xf32>,
    return
  }
  func.func @transform_0(%arg0: i32, %arg1: i32) -> (i32, i32, i32) {
    %c0_i32 = arith.constant 0 : i32
    %c0_i32_0 = arith.constant 0 : i32
    %c0_i32_1 = arith.constant 0 : i32
    return %arg0, %c0_i32, %c0_i32_0 : i32, i32, i32
  }
  func.func @transform_1(%arg0: i32, %arg1: i32) -> (i32, i32, i32) {
    %c0_i32 = arith.constant 0 : i32
    %c0_i32_0 = arith.constant 0 : i32
    return %arg0, %c0_i32, %arg1 : i32, i32, i32
  }
  func.func @transform_2(%arg0: i32, %arg1: i32) -> (i32, i32, i32) {
    %c0_i32 = arith.constant 0 : i32
    %c0_i32_0 = arith.constant 0 : i32
    %c0_i32_1 = arith.constant 0 : i32
    return %arg0, %c0_i32, %c0_i32_0 : i32, i32, i32
  }
  func.func @transform_3(%arg0: i32, %arg1: i32) -> (i32, i32, i32) {
    %c0_i32 = arith.constant 0 : i32
    %c0_i32_0 = arith.constant 0 : i32
    return %arg0, %c0_i32, %arg1 : i32, i32, i32
  }
}

module attributes {stable_mosaic.version = 11 : i64} {
  func.func @_matmul_bias_relu_kernel(%arg0: i32, %arg1: i32, %arg2: memref<1x20x90xbf16, #tpu.memory_space<vmem>>, %arg3: memref<1x90x128xbf16, #tpu.memory_space<vmem>>, %arg4: memref<1x20x1xf32, #tpu.memory_space<vmem>>, %arg5: memref<1x20x128xf32, #tpu.memory_space<vmem>>) attributes {dimension_semantics = [#tpu.dimension_semantics<parallel>, #tpu.dimension_semantics<parallel>], iteration_bounds = array<i64: 2, 1>, scalar_prefetch = 0 : i64, scratch_operands = 0 : i64, tpu.core_type = #tpu.core_type<tc>, window_params = [{transform_indices = @transform_0, window_bounds = array<i64: 1, 20, 90>}, {transform_indices = @transform_1, window_bounds = array<i64: 1, 90, 128>}, {transform_indices = @transform_2, window_bounds = array<i64: 1, 20, 1>}, {transform_indices = @transform_3, window_bounds = array<i64: 1, 20, 128>}]} {
    %c0 = arith.constant 0 : index
    %c0_0 = arith.constant 0 : index
    %c0_1 = arith.constant 0 : index
    %0 = vector.load %arg2[%c0, %c0_0, %c0_1] : memref<1x20x90xbf16, #tpu.memory_space<vmem>>, vector<1x20x90xbf16>
    %1 = vector.shape_cast %0 : vector<1x20x90xbf16> to vector<20x90xbf16>
    %c0_2 = arith.constant 0 : index
    %c0_3 = arith.constant 0 : index
    %c0_4 = arith.constant 0 : index
    %2 = vector.load %arg3[%c0_2, %c0_3, %c0_4] : memref<1x90x128xbf16, #tpu.memory_space<vmem>>, vector<1x90x128xbf16>
    %3 = vector.shape_cast %2 : vector<1x90x128xbf16> to vector<90x128xbf16>
    %cst = arith.constant dense<0.000000e+00> : vector<20x128xf32>
    %4 = tpu.matmul %1, %3, %cst {dimension_numbers = #tpu.dot_dimension_numbers<[1], [0], [0], [1], [0, 0, 1, 1], [], []>} : vector<20x90xbf16>, vector<90x128xbf16>, vector<20x128xf32> -> vector<20x128xf32>
    %c0_5 = arith.constant 0 : index
    %c0_6 = arith.constant 0 : index
    %c0_7 = arith.constant 0 : index
    %5 = vector.load %arg4[%c0_5, %c0_6, %c0_7] : memref<1x20x1xf32, #tpu.memory_space<vmem>>, vector<1x20x1xf32>
    %6 = vector.shape_cast %5 : vector<1x20x1xf32> to vector<20x1xf32>
    %7 = vector.broadcast %6 : vector<20x1xf32> to vector<20x128xf32>
    %8 = arith.addf %4, %7 : vector<20x128xf32>
    %cst_8 = arith.constant 0.000000e+00 : f32
    %9 = vector.broadcast %cst_8 : f32 to vector<20x128xf32>
    %10 = arith.maximumf %8, %9 : vector<20x128xf32>
    %c0_9 = arith.constant 0 : index
    %c0_10 = arith.constant 0 : index
    %c0_11 = arith.constant 0 : index
    %11 = vector.load %arg5[%c0_9, %c0_10, %c0_11] : memref<1x20x128xf32, #tpu.memory_space<vmem>>, vector<1x20x128xf32>
    %12 = vector.shape_cast %11 : vector<1x20x128xf32> to vector<20x128xf32>
    %13 = vector.shape_cast %10 : vector<20x128xf32> to vector<1x20x128xf32>
    tpu.vector_store %arg5[%c0_9, %c0_10, %c0_11], %13 {strides = array<i32>} : memref<1x20x128xf32, #tpu.memory_space<vmem>>, vector<1x20x128xf32>,
    return
  }
  func.func @transform_0(%arg0: i32, %arg1: i32) -> (i32, i32, i32) {
    %c0_i32 = arith.constant 0 : i32
    %c0_i32_0 = arith.constant 0 : i32
    %c0_i32_1 = arith.constant 0 : i32
    return %arg0, %c0_i32, %c0_i32_0 : i32, i32, i32
  }
  func.func @transform_1(%arg0: i32, %arg1: i32) -> (i32, i32, i32) {
    %c0_i32 = arith.constant 0 : i32
    %c0_i32_0 = arith.constant 0 : i32
    return %arg0, %c0_i32, %arg1 : i32, i32, i32
  }
  func.func @transform_2(%arg0: i32, %arg1: i32) -> (i32, i32, i32) {
    %c0_i32 = arith.constant 0 : i32
    %c0_i32_0 = arith.constant 0 : i32
    %c0_i32_1 = arith.constant 0 : i32
    return %arg0, %c0_i32, %c0_i32_0 : i32, i32, i32
  }
  func.func @transform_3(%arg0: i32, %arg1: i32) -> (i32, i32, i32) {
    %c0_i32 = arith.constant 0 : i32
    %c0_i32_0 = arith.constant 0 : i32
    return %arg0, %c0_i32, %arg1 : i32, i32, i32
  }
}

module attributes {stable_mosaic.version = 11 : i64} {
  func.func @_matmul_bias_relu_kernel(%arg0: i32, %arg1: i32, %arg2: memref<1x30x320xbf16, #tpu.memory_space<vmem>>, %arg3: memref<1x320x32xbf16, #tpu.memory_space<vmem>>, %arg4: memref<1x30x1xf32, #tpu.memory_space<vmem>>, %arg5: memref<1x30x32xf32, #tpu.memory_space<vmem>>) attributes {dimension_semantics = [#tpu.dimension_semantics<parallel>, #tpu.dimension_semantics<parallel>], iteration_bounds = array<i64: 2, 1>, scalar_prefetch = 0 : i64, scratch_operands = 0 : i64, tpu.core_type = #tpu.core_type<tc>, window_params = [{transform_indices = @transform_0, window_bounds = array<i64: 1, 30, 320>}, {transform_indices = @transform_1, window_bounds = array<i64: 1, 320, 32>}, {transform_indices = @transform_2, window_bounds = array<i64: 1, 30, 1>}, {transform_indices = @transform_3, window_bounds = array<i64: 1, 30, 32>}]} {
    %c0 = arith.constant 0 : index
    %c0_0 = arith.constant 0 : index
    %c0_1 = arith.constant 0 : index
    %0 = vector.load %arg2[%c0, %c0_0, %c0_1] : memref<1x30x320xbf16, #tpu.memory_space<vmem>>, vector<1x30x320xbf16>
    %1 = vector.shape_cast %0 : vector<1x30x320xbf16> to vector<30x320xbf16>
    %c0_2 = arith.constant 0 : index
    %c0_3 = arith.constant 0 : index
    %c0_4 = arith.constant 0 : index
    %2 = vector.load %arg3[%c0_2, %c0_3, %c0_4] : memref<1x320x32xbf16, #tpu.memory_space<vmem>>, vector<1x320x32xbf16>
    %3 = vector.shape_cast %2 : vector<1x320x32xbf16> to vector<320x32xbf16>
    %cst = arith.constant dense<0.000000e+00> : vector<30x32xf32>
    %4 = tpu.matmul %1, %3, %cst {dimension_numbers = #tpu.dot_dimension_numbers<[1], [0], [0], [1], [0, 0, 1, 1], [], []>} : vector<30x320xbf16>, vector<320x32xbf16>, vector<30x32xf32> -> vector<30x32xf32>
    %c0_5 = arith.constant 0 : index
    %c0_6 = arith.constant 0 : index
    %c0_7 = arith.constant 0 : index
    %5 = vector.load %arg4[%c0_5, %c0_6, %c0_7] : memref<1x30x1xf32, #tpu.memory_space<vmem>>, vector<1x30x1xf32>
    %6 = vector.shape_cast %5 : vector<1x30x1xf32> to vector<30x1xf32>
    %7 = vector.broadcast %6 : vector<30x1xf32> to vector<30x32xf32>
    %8 = arith.addf %4, %7 : vector<30x32xf32>
    %cst_8 = arith.constant 0.000000e+00 : f32
    %9 = vector.broadcast %cst_8 : f32 to vector<30x32xf32>
    %10 = arith.maximumf %8, %9 : vector<30x32xf32>
    %c0_9 = arith.constant 0 : index
    %c0_10 = arith.constant 0 : index
    %c0_11 = arith.constant 0 : index
    %11 = vector.load %arg5[%c0_9, %c0_10, %c0_11] : memref<1x30x32xf32, #tpu.memory_space<vmem>>, vector<1x30x32xf32>
    %12 = vector.shape_cast %11 : vector<1x30x32xf32> to vector<30x32xf32>
    %13 = vector.shape_cast %10 : vector<30x32xf32> to vector<1x30x32xf32>
    tpu.vector_store %arg5[%c0_9, %c0_10, %c0_11], %13 {strides = array<i32>} : memref<1x30x32xf32, #tpu.memory_space<vmem>>, vector<1x30x32xf32>,
    return
  }
  func.func @transform_0(%arg0: i32, %arg1: i32) -> (i32, i32, i32) {
    %c0_i32 = arith.constant 0 : i32
    %c0_i32_0 = arith.constant 0 : i32
    %c0_i32_1 = arith.constant 0 : i32
    return %arg0, %c0_i32, %c0_i32_0 : i32, i32, i32
  }
  func.func @transform_1(%arg0: i32, %arg1: i32) -> (i32, i32, i32) {
    %c0_i32 = arith.constant 0 : i32
    %c0_i32_0 = arith.constant 0 : i32
    return %arg0, %c0_i32, %arg1 : i32, i32, i32
  }
  func.func @transform_2(%arg0: i32, %arg1: i32) -> (i32, i32, i32) {
    %c0_i32 = arith.constant 0 : i32
    %c0_i32_0 = arith.constant 0 : i32
    %c0_i32_1 = arith.constant 0 : i32
    return %arg0, %c0_i32, %c0_i32_0 : i32, i32, i32
  }
  func.func @transform_3(%arg0: i32, %arg1: i32) -> (i32, i32, i32) {
    %c0_i32 = arith.constant 0 : i32
    %c0_i32_0 = arith.constant 0 : i32
    return %arg0, %c0_i32, %arg1 : i32, i32, i32
  }
}

module attributes {stable_mosaic.version = 11 : i64} {
  func.func @_matmul_bias_relu_kernel(%arg0: i32, %arg1: i32, %arg2: memref<1x80x270xbf16, #tpu.memory_space<vmem>>, %arg3: memref<1x270x32xbf16, #tpu.memory_space<vmem>>, %arg4: memref<1x80x1xf32, #tpu.memory_space<vmem>>, %arg5: memref<1x80x32xf32, #tpu.memory_space<vmem>>) attributes {dimension_semantics = [#tpu.dimension_semantics<parallel>, #tpu.dimension_semantics<parallel>], iteration_bounds = array<i64: 2, 1>, scalar_prefetch = 0 : i64, scratch_operands = 0 : i64, tpu.core_type = #tpu.core_type<tc>, window_params = [{transform_indices = @transform_0, window_bounds = array<i64: 1, 80, 270>}, {transform_indices = @transform_1, window_bounds = array<i64: 1, 270, 32>}, {transform_indices = @transform_2, window_bounds = array<i64: 1, 80, 1>}, {transform_indices = @transform_3, window_bounds = array<i64: 1, 80, 32>}]} {
    %c0 = arith.constant 0 : index
    %c0_0 = arith.constant 0 : index
    %c0_1 = arith.constant 0 : index
    %0 = vector.load %arg2[%c0, %c0_0, %c0_1] : memref<1x80x270xbf16, #tpu.memory_space<vmem>>, vector<1x80x270xbf16>
    %1 = vector.shape_cast %0 : vector<1x80x270xbf16> to vector<80x270xbf16>
    %c0_2 = arith.constant 0 : index
    %c0_3 = arith.constant 0 : index
    %c0_4 = arith.constant 0 : index
    %2 = vector.load %arg3[%c0_2, %c0_3, %c0_4] : memref<1x270x32xbf16, #tpu.memory_space<vmem>>, vector<1x270x32xbf16>
    %3 = vector.shape_cast %2 : vector<1x270x32xbf16> to vector<270x32xbf16>
    %cst = arith.constant dense<0.000000e+00> : vector<80x32xf32>
    %4 = tpu.matmul %1, %3, %cst {dimension_numbers = #tpu.dot_dimension_numbers<[1], [0], [0], [1], [0, 0, 1, 1], [], []>} : vector<80x270xbf16>, vector<270x32xbf16>, vector<80x32xf32> -> vector<80x32xf32>
    %c0_5 = arith.constant 0 : index
    %c0_6 = arith.constant 0 : index
    %c0_7 = arith.constant 0 : index
    %5 = vector.load %arg4[%c0_5, %c0_6, %c0_7] : memref<1x80x1xf32, #tpu.memory_space<vmem>>, vector<1x80x1xf32>
    %6 = vector.shape_cast %5 : vector<1x80x1xf32> to vector<80x1xf32>
    %7 = vector.broadcast %6 : vector<80x1xf32> to vector<80x32xf32>
    %8 = arith.addf %4, %7 : vector<80x32xf32>
    %cst_8 = arith.constant 0.000000e+00 : f32
    %9 = vector.broadcast %cst_8 : f32 to vector<80x32xf32>
    %10 = arith.maximumf %8, %9 : vector<80x32xf32>
    %c0_9 = arith.constant 0 : index
    %c0_10 = arith.constant 0 : index
    %c0_11 = arith.constant 0 : index
    %11 = vector.load %arg5[%c0_9, %c0_10, %c0_11] : memref<1x80x32xf32, #tpu.memory_space<vmem>>, vector<1x80x32xf32>
    %12 = vector.shape_cast %11 : vector<1x80x32xf32> to vector<80x32xf32>
    %13 = vector.shape_cast %10 : vector<80x32xf32> to vector<1x80x32xf32>
    tpu.vector_store %arg5[%c0_9, %c0_10, %c0_11], %13 {strides = array<i32>} : memref<1x80x32xf32, #tpu.memory_space<vmem>>, vector<1x80x32xf32>,
    return
  }
  func.func @transform_0(%arg0: i32, %arg1: i32) -> (i32, i32, i32) {
    %c0_i32 = arith.constant 0 : i32
    %c0_i32_0 = arith.constant 0 : i32
    %c0_i32_1 = arith.constant 0 : i32
    return %arg0, %c0_i32, %c0_i32_0 : i32, i32, i32
  }
  func.func @transform_1(%arg0: i32, %arg1: i32) -> (i32, i32, i32) {
    %c0_i32 = arith.constant 0 : i32
    %c0_i32_0 = arith.constant 0 : i32
    return %arg0, %c0_i32, %arg1 : i32, i32, i32
  }
  func.func @transform_2(%arg0: i32, %arg1: i32) -> (i32, i32, i32) {
    %c0_i32 = arith.constant 0 : i32
    %c0_i32_0 = arith.constant 0 : i32
    %c0_i32_1 = arith.constant 0 : i32
    return %arg0, %c0_i32, %c0_i32_0 : i32, i32, i32
  }
  func.func @transform_3(%arg0: i32, %arg1: i32) -> (i32, i32, i32) {
    %c0_i32 = arith.constant 0 : i32
    %c0_i32_0 = arith.constant 0 : i32
    return %arg0, %c0_i32, %arg1 : i32, i32, i32
  }
}

module attributes {stable_mosaic.version = 11 : i64} {
  func.func @_matmul_bias_relu_kernel(%arg0: i32, %arg1: i32, %arg2: memref<1x10x180xbf16, #tpu.memory_space<vmem>>, %arg3: memref<1x180x128xbf16, #tpu.memory_space<vmem>>, %arg4: memref<1x10x1xf32, #tpu.memory_space<vmem>>, %arg5: memref<1x10x128xf32, #tpu.memory_space<vmem>>) attributes {dimension_semantics = [#tpu.dimension_semantics<parallel>, #tpu.dimension_semantics<parallel>], iteration_bounds = array<i64: 2, 1>, scalar_prefetch = 0 : i64, scratch_operands = 0 : i64, tpu.core_type = #tpu.core_type<tc>, window_params = [{transform_indices = @transform_0, window_bounds = array<i64: 1, 10, 180>}, {transform_indices = @transform_1, window_bounds = array<i64: 1, 180, 128>}, {transform_indices = @transform_2, window_bounds = array<i64: 1, 10, 1>}, {transform_indices = @transform_3, window_bounds = array<i64: 1, 10, 128>}]} {
    %c0 = arith.constant 0 : index
    %c0_0 = arith.constant 0 : index
    %c0_1 = arith.constant 0 : index
    %0 = vector.load %arg2[%c0, %c0_0, %c0_1] : memref<1x10x180xbf16, #tpu.memory_space<vmem>>, vector<1x10x180xbf16>
    %1 = vector.shape_cast %0 : vector<1x10x180xbf16> to vector<10x180xbf16>
    %c0_2 = arith.constant 0 : index
    %c0_3 = arith.constant 0 : index
    %c0_4 = arith.constant 0 : index
    %2 = vector.load %arg3[%c0_2, %c0_3, %c0_4] : memref<1x180x128xbf16, #tpu.memory_space<vmem>>, vector<1x180x128xbf16>
    %3 = vector.shape_cast %2 : vector<1x180x128xbf16> to vector<180x128xbf16>
    %cst = arith.constant dense<0.000000e+00> : vector<10x128xf32>
    %4 = tpu.matmul %1, %3, %cst {dimension_numbers = #tpu.dot_dimension_numbers<[1], [0], [0], [1], [0, 0, 1, 1], [], []>} : vector<10x180xbf16>, vector<180x128xbf16>, vector<10x128xf32> -> vector<10x128xf32>
    %c0_5 = arith.constant 0 : index
    %c0_6 = arith.constant 0 : index
    %c0_7 = arith.constant 0 : index
    %5 = vector.load %arg4[%c0_5, %c0_6, %c0_7] : memref<1x10x1xf32, #tpu.memory_space<vmem>>, vector<1x10x1xf32>
    %6 = vector.shape_cast %5 : vector<1x10x1xf32> to vector<10x1xf32>
    %7 = vector.broadcast %6 : vector<10x1xf32> to vector<10x128xf32>
    %8 = arith.addf %4, %7 : vector<10x128xf32>
    %cst_8 = arith.constant 0.000000e+00 : f32
    %9 = vector.broadcast %cst_8 : f32 to vector<10x128xf32>
    %10 = arith.maximumf %8, %9 : vector<10x128xf32>
    %c0_9 = arith.constant 0 : index
    %c0_10 = arith.constant 0 : index
    %c0_11 = arith.constant 0 : index
    %11 = vector.load %arg5[%c0_9, %c0_10, %c0_11] : memref<1x10x128xf32, #tpu.memory_space<vmem>>, vector<1x10x128xf32>
    %12 = vector.shape_cast %11 : vector<1x10x128xf32> to vector<10x128xf32>
    %13 = vector.shape_cast %10 : vector<10x128xf32> to vector<1x10x128xf32>
    tpu.vector_store %arg5[%c0_9, %c0_10, %c0_11], %13 {strides = array<i32>} : memref<1x10x128xf32, #tpu.memory_space<vmem>>, vector<1x10x128xf32>,
    return
  }
  func.func @transform_0(%arg0: i32, %arg1: i32) -> (i32, i32, i32) {
    %c0_i32 = arith.constant 0 : i32
    %c0_i32_0 = arith.constant 0 : i32
    %c0_i32_1 = arith.constant 0 : i32
    return %arg0, %c0_i32, %c0_i32_0 : i32, i32, i32
  }
  func.func @transform_1(%arg0: i32, %arg1: i32) -> (i32, i32, i32) {
    %c0_i32 = arith.constant 0 : i32
    %c0_i32_0 = arith.constant 0 : i32
    return %arg0, %c0_i32, %arg1 : i32, i32, i32
  }
  func.func @transform_2(%arg0: i32, %arg1: i32) -> (i32, i32, i32) {
    %c0_i32 = arith.constant 0 : i32
    %c0_i32_0 = arith.constant 0 : i32
    %c0_i32_1 = arith.constant 0 : i32
    return %arg0, %c0_i32, %c0_i32_0 : i32, i32, i32
  }
  func.func @transform_3(%arg0: i32, %arg1: i32) -> (i32, i32, i32) {
    %c0_i32 = arith.constant 0 : i32
    %c0_i32_0 = arith.constant 0 : i32
    return %arg0, %c0_i32, %arg1 : i32, i32, i32
  }
}

module attributes {stable_mosaic.version = 11 : i64} {
  func.func @_matmul_bias_relu_kernel(%arg0: i32, %arg1: i32, %arg2: memref<1x4x90xbf16, #tpu.memory_space<vmem>>, %arg3: memref<1x90x128xbf16, #tpu.memory_space<vmem>>, %arg4: memref<1x4x1xf32, #tpu.memory_space<vmem>>, %arg5: memref<1x4x128xf32, #tpu.memory_space<vmem>>) attributes {dimension_semantics = [#tpu.dimension_semantics<parallel>, #tpu.dimension_semantics<parallel>], iteration_bounds = array<i64: 2, 1>, scalar_prefetch = 0 : i64, scratch_operands = 0 : i64, tpu.core_type = #tpu.core_type<tc>, window_params = [{transform_indices = @transform_0, window_bounds = array<i64: 1, 4, 90>}, {transform_indices = @transform_1, window_bounds = array<i64: 1, 90, 128>}, {transform_indices = @transform_2, window_bounds = array<i64: 1, 4, 1>}, {transform_indices = @transform_3, window_bounds = array<i64: 1, 4, 128>}]} {
    %c0 = arith.constant 0 : index
    %c0_0 = arith.constant 0 : index
    %c0_1 = arith.constant 0 : index
    %0 = vector.load %arg2[%c0, %c0_0, %c0_1] : memref<1x4x90xbf16, #tpu.memory_space<vmem>>, vector<1x4x90xbf16>
    %1 = vector.shape_cast %0 : vector<1x4x90xbf16> to vector<4x90xbf16>
    %c0_2 = arith.constant 0 : index
    %c0_3 = arith.constant 0 : index
    %c0_4 = arith.constant 0 : index
    %2 = vector.load %arg3[%c0_2, %c0_3, %c0_4] : memref<1x90x128xbf16, #tpu.memory_space<vmem>>, vector<1x90x128xbf16>
    %3 = vector.shape_cast %2 : vector<1x90x128xbf16> to vector<90x128xbf16>
    %cst = arith.constant dense<0.000000e+00> : vector<4x128xf32>
    %4 = tpu.matmul %1, %3, %cst {dimension_numbers = #tpu.dot_dimension_numbers<[1], [0], [0], [1], [0, 0, 1, 1], [], []>} : vector<4x90xbf16>, vector<90x128xbf16>, vector<4x128xf32> -> vector<4x128xf32>
    %c0_5 = arith.constant 0 : index
    %c0_6 = arith.constant 0 : index
    %c0_7 = arith.constant 0 : index
    %5 = vector.load %arg4[%c0_5, %c0_6, %c0_7] : memref<1x4x1xf32, #tpu.memory_space<vmem>>, vector<1x4x1xf32>
    %6 = vector.shape_cast %5 : vector<1x4x1xf32> to vector<4x1xf32>
    %7 = vector.broadcast %6 : vector<4x1xf32> to vector<4x128xf32>
    %8 = arith.addf %4, %7 : vector<4x128xf32>
    %cst_8 = arith.constant 0.000000e+00 : f32
    %9 = vector.broadcast %cst_8 : f32 to vector<4x128xf32>
    %10 = arith.maximumf %8, %9 : vector<4x128xf32>
    %c0_9 = arith.constant 0 : index
    %c0_10 = arith.constant 0 : index
    %c0_11 = arith.constant 0 : index
    %11 = vector.load %arg5[%c0_9, %c0_10, %c0_11] : memref<1x4x128xf32, #tpu.memory_space<vmem>>, vector<1x4x128xf32>
    %12 = vector.shape_cast %11 : vector<1x4x128xf32> to vector<4x128xf32>
    %13 = vector.shape_cast %10 : vector<4x128xf32> to vector<1x4x128xf32>
    tpu.vector_store %arg5[%c0_9, %c0_10, %c0_11], %13 {strides = array<i32>} : memref<1x4x128xf32, #tpu.memory_space<vmem>>, vector<1x4x128xf32>,
    return
  }
  func.func @transform_0(%arg0: i32, %arg1: i32) -> (i32, i32, i32) {
    %c0_i32 = arith.constant 0 : i32
    %c0_i32_0 = arith.constant 0 : i32
    %c0_i32_1 = arith.constant 0 : i32
    return %arg0, %c0_i32, %c0_i32_0 : i32, i32, i32
  }
  func.func @transform_1(%arg0: i32, %arg1: i32) -> (i32, i32, i32) {
    %c0_i32 = arith.constant 0 : i32
    %c0_i32_0 = arith.constant 0 : i32
    return %arg0, %c0_i32, %arg1 : i32, i32, i32
  }
  func.func @transform_2(%arg0: i32, %arg1: i32) -> (i32, i32, i32) {
    %c0_i32 = arith.constant 0 : i32
    %c0_i32_0 = arith.constant 0 : i32
    %c0_i32_1 = arith.constant 0 : i32
    return %arg0, %c0_i32, %c0_i32_0 : i32, i32, i32
  }
  func.func @transform_3(%arg0: i32, %arg1: i32) -> (i32, i32, i32) {
    %c0_i32 = arith.constant 0 : i32
    %c0_i32_0 = arith.constant 0 : i32
    return %arg0, %c0_i32, %arg1 : i32, i32, i32
  }
}

</mosaic_0001>

<bundles_post_ra>
// kernel: networks_forward.6
= control target key start
LH: loop header
LB: loop body
LE: loop exit
PB: predicated region body
PF: predicated region fallthrough
CT: control target
= control target key end

     0   :  { %8 = vsyncpa [#allocation3], 0  ;;  %s820_s0 = inlined_call_operand.hbm [shape: bf16[2,10,16], index: 0, kind: input, shape index: {}]   ;;  %s821_s1 = inlined_call_operand.vmem [shape: bf16[2,16,128], index: 1, kind: input, shape index: {}]   ;;  %s822_s2 = inlined_call_operand.hbm [shape: f32[2,10,1], index: 2, kind: input, shape index: {}]   ;;  %s823_s3 = inlined_call_operand.vmem [shape: f32[2,10,128], index: 3, kind: output, shape index: {}]  }
   0x1   :  { %10 = vsyncpa [#allocation3 + $0x1], 0 }
   0x2   :  { %11 = vsyncpa [#allocation5], 0 }
   0x3   :  { %13 = vsyncpa [#allocation5 + $0x1], 0  ;;  %s707_s12 = smov 0   ;;  %s709_s13 = smov 0  }
   0x4   :  { %s711_s14 = smov 0   ;;  %s713_s15 = smov 0  }
   0x5   :  { %s715_s16 = smov 0   ;;  %s717_s17 = smov 0  }
   0x6 LB: > { %s466_s18 = sadd.s32 4294967295, %s680_s17   ;;  %s31_s19 = sadd.s32 1, %s676_s16  ;;  %s680_s17 = sphi %s717_s17, %s19_s17   ;;  %s676_s16 = sphi %s715_s16, %s831_s16   ;;  %s672_s15 = sphi %s713_s15, %s830_s15   ;;  %s668_s14 = sphi %s711_s14, %s829_s14   ;;  %s664_s13 = sphi %s709_s13, %s828_s13   ;;  %s660_s12 = sphi %s707_s12, %s827_s12  }
   0x7   : > { %p33_p0 = scmp.ge.s32.totalorder %s31_s19, 2  ;;  %s38_s20 = sadd.s32 1, %s668_s14 }
   0x8   : > { %p45_p1 = scmp.ne.s32.totalorder %s668_s14, %s664_s13  ;;  %p46_p2 = scmp.eq.s32.totalorder %s680_s17, 0 }
   0x9   : > { %s833_s19 = smov (%p33_p0, %s31_s19), 0  ;;  %p51_p4 = scmp.ne.s32.totalorder %s664_s13, %s660_s12 }
   0xa   : > { %p743_p3 = por %p46_p2, %p45_p1  ;;  %s35_s22 = ssub.s32 %s676_s16, %s833_s19 }
   0xb   : > { %p52_p5 = scmp.eq.s32.totalorder %s466_s18, 0  ;;  %p36_p6 = scmp.eq.s32.totalorder %s35_s22, 0 }
   0xc   : > { %p511_p8 = scmp.lt.s32.totalorder %s680_s17, 2  ;;  %s759_s25 = sand.u32 1, %s668_s14  }
   0xd   : > { %p750_p7 = por %p52_p5, %p51_p4  ;;  %s494_s26 = sshll.u32 %s676_s16, 3 }
   0xe   : > { %s756_s24 = scalar_select %p36_p6, %s668_s14, %s38_s20  }
   0xf   : > { %s470_s27 = sshll.u32 %s759_s25, 3  ;;  %s166_s30 = scalar_lea.hbm %s820_s0, %s494_s26 }
  0x10   : > { %s167_s4 = sshll.u32 %s166_s30, 4  ;;  %s161_s5 = scalar_lea.vmem [#allocation2], %s470_s27  ;;  %s168_s4 = int_to_ptr.hbm [resolvable:$true] %s167_s4 }
  0x11   : > { %s169_s6 = sshll.u32 %s161_s5, 4  ;;  %p768_p9 = pnand %p511_p8, %p743_p3  ;;  %s170_s6 = int_to_ptr.vmem [resolvable:$true] %s169_s6 }
  0x12   : > { %p476_p10 = scmp.ge.s32.totalorder %s680_s17, 1  ;;  %p210_p11 = scmp.lt.s32.totalorder %s680_s17, 3 }
  0x13   : > { %s158_s8 = scalar_lea.sflag [#allocation3], %s759_s25  ;;  %s682_s9 = smov 64  }
  0x14   : > { %s683_s10 = smov 4   ;;  %p211_p12 = pnand %p476_p10, %p210_p11 }
  0x15   : > { %507 = dma.hbm_to_vmem [thread:$0]  (!%p768_p9), %s168_s4, 128, %s170_s6, %s158_s8, %s682_s9, %s682_s9, %s683_s10  }
  0x16   : > { %s473_s11 = sshll.u32 %s759_s25, 4  ;;  %s495_s12 = sshll.u32 %s676_s16, 4 }
  0x17   : > { %s199_s21 = scalar_lea.hbm %s822_s2, %s495_s12  ;;  %s194_s26 = scalar_lea.vmem [#allocation4], %s473_s11 }
  0x18   : > { %s200_s22 = sshll.u32 %s199_s21, 4  ;;  %s202_s27 = sshll.u32 %s194_s26, 4  ;;  %s201_s22 = int_to_ptr.hbm [resolvable:$true] %s200_s22  ;;  %s203_s27 = int_to_ptr.vmem [resolvable:$true] %s202_s27 }
  0x19   : > { %s191_s28 = scalar_lea.sflag [#allocation5], %s759_s25  ;;  %s684_s29 = smov 128  }
  0x1a   : > { %s685_s30 = smov 8   ;;  %214 = sbr.rel (%p211_p12) target bundleno = 183 (0xb7), region = 32 }
  0x1b   : > { %510 = dma.hbm_to_vmem [thread:$0]  (!%p768_p9), %s201_s22, 256, %s203_s27, %s191_s28, %s684_s29, %s684_s29, %s685_s30  }
  0x1c   : > { %s216_s4 = sand.u32 (!%p211_p12), 1, %s664_s13  }
  0x1d   : > { %s477_s5 = sshll.u32 (!%p211_p12), %s216_s4, 3  ;;  %s217_s6 = scalar_lea.sflag (!%p211_p12), [#allocation3], %s216_s4 }
  0x1e   : > { %s220_s8 = scalar_lea.vmem (!%p211_p12), [#allocation2], %s477_s5 }
  0x1f   : > { %651 = dma.done.wait (%p750_p7), %s217_s6, 128  }
  0x20   : > { %653 = vsyncadd (%p750_p7), %s217_s6, 4294967168  ;;  %s478_s9 = sshll.u32 %s216_s4, 4  ;;  %s227_s10 = scalar_lea.sflag [#allocation5], %s216_s4 }
  0x21   : > { %s230_s25 = scalar_lea.vmem [#allocation4], %s478_s9 }
  0x22   : > { %655 = dma.done.wait (%p750_p7), %s227_s10, 256  }
  0x23   : > { %657 = vsyncadd (%p750_p7), %s227_s10, 4294967040  ;;  %p270_p13 = scmp.lt.s32.totalorder %s672_s15, 1  ;;  %v686_v0 = vmov 0   ;;  %v485_v2 = vld [vmem:[%s220_s8] sm:$0xf]  ;;  %v291_v5 = vld [vmem:[%s230_s25] sm:$0xff] }
  0x24   : > { %565 = vset.pattern.permute.xlu0 %v686_v0  ;;  %v498_v3 = vld [vmem:[%s220_s8] sm:$0x10]  ;;  %vm314_vm0 = vcmask 130048   ;;  %v292_v6 = vld [vmem:[%s230_s25 + $0x8] sm:$0x3] }
  0x25   : > { %s835_s15 = smov (!%p270_p13, %s672_s15), 1  ;;  %v486_v4 = vor.u32 %v498_v3, %v485_v2  ;;  %295 = vperm.xlu0 %565, %v291_v5  }
  0x26   : > { %s496_s7 = sshll.u32 %s835_s15, 3  ;;  %s497_s23 = sshll.u32 %s835_s15, 4 }
  0x27   : > { %s277_s18 = scalar_lea.vmem %s821_s1, %s496_s7  ;;  %s285_s22 = scalar_lea.vmem %s823_s3, %s497_s23 }
  0x28   : > { %v499_v1 = vld [vmem:[%s277_s18] sm:$0xff] }
  0x29   : > { %325 = vmatpush.bf16.msra.mxu0 %v499_v1 }
  0x2c   : > { %491 = vmatmul.msk.bf16.vlgmr.msra.gmra.mxu0 %vm314_vm0, %v486_v4 }
  0x2d   : > { %300 = vperm.xlu0 %565, %v292_v6  }
  0x97   : > { %v296_v7 = vpop.permute.xlu0 %295 }
  0x9f   : > { %v301_v11 = vpop.permute.xlu0 %300 }
  0xa9   : > { %v327_v8 = vpop.f32.mrf.mxu0 }
  0xaa   : > { %v328_v9 = vadd.f32 %v327_v8, %v296_v7 }
  0xac   : > { %v332_v10 = vmax.f32 %v328_v9, 0.0 }
  0xae   : > { %334 = vst [vmem:[%s285_s22] sm:$0xff] %v332_v10 }
  0xb1   : > { %v329_v12 = vpop.f32.mrf.mxu0 }
  0xb2   : > { %v330_v13 = vadd.f32 %v329_v12, %v301_v11 }
  0xb4   : > { %v333_v14 = vmax.f32 %v330_v13, 0.0 }
  0xb6   : > { %335 = vst [vmem:[%s285_s22 + $0x8] sm:$0x3] %v333_v14 }
  0xb7 PF: > { %s19_s17 = sadd.s32 1, %s680_s17   ;;  %s827_s12 = smov %s664_s13 }
  0xb8   : > { %p16_p0 = scmp.ge.s32.totalorder %s19_s17, 4   ;;  %s828_s13 = smov %s668_s14 }
  0xb9   : > { %s829_s14 = smov %s756_s24  ;;  %s830_s15 = smov %s676_s16 }
  0xba   : > { %s831_s16 = smov %s833_s19  ;;  %18 = sbr.rel (!%p16_p0) target bundleno = 6 (0x6), region = 88 }
  0xbf   :  { %363 = vsyncpa [#allocation3], 1 }
  0xc0   :  { %365 = vsyncpa [#allocation3 + $0x1], 1 }
  0xc1   :  { %366 = vsyncpa [#allocation5], 1 }
  0xc2   :  { %368 = vsyncpa [#allocation5 + $0x1], 1 }

// kernel: networks_forward.7
= control target key start
LH: loop header
LB: loop body
LE: loop exit
PB: predicated region body
PF: predicated region fallthrough
CT: control target
= control target key end

     0   :  { %s590_s12 = smov 0   ;;  %s592_s13 = smov 0   ;;  %s647_s0 = inlined_call_operand.vmem [shape: bf16[2,20,90], index: 0, kind: input, shape index: {}]   ;;  %s648_s1 = inlined_call_operand.vmem [shape: bf16[2,90,128], index: 1, kind: input, shape index: {}]   ;;  %s649_s2 = inlined_call_operand.vmem [shape: f32[2,20,1], index: 2, kind: input, shape index: {}]   ;;  %s650_s3 = inlined_call_operand.vmem [shape: f32[2,20,128], index: 3, kind: output, shape index: {}]  }
   0x1   :  { %s594_s14 = smov 0  }
   0x2 LB: > { %s25_s15 = sadd.s32 1, %s563_s13  ;;  %p465_p0 = scmp.ge.s32.totalorder %s567_s14, 1  ;;  %s567_s14 = sphi %s594_s14, %s13_s14   ;;  %s563_s13 = sphi %s592_s13, %s652_s13   ;;  %s559_s12 = sphi %s590_s12, %s651_s12  }
   0x3   : > { %p27_p1 = scmp.ge.s32.totalorder %s25_s15, 2  ;;  %p176_p2 = scmp.lt.s32.totalorder %s567_s14, 3 }
   0x5   : > { %s654_s15 = smov (%p27_p1, %s25_s15), 0  ;;  %p177_p3 = pnand %p465_p0, %p176_p2 }
   0x6   : > { %p216_p4 = scmp.lt.s32.totalorder (!%p177_p3), %s559_s12, 1 }
   0x7   : > { %180 = sbr.rel (%p177_p3) target bundleno = 182 (0xb6), region = 32 }
   0xc   : > { %s656_s12 = smov (!%p216_p4, %s559_s12), 1  ;;  %v569_v0 = vmov 0   ;;  %vm326_vm0 = vcmask 1044480   ;;  %vm319_vm1 = vcmask 736256  }
   0xd   : > { %543 = vset.pattern.permute.xlu0 %v569_v0  ;;  %544 = vset.pattern.permute.xlu1 %v569_v0  ;;  %s516_s16 = smul.u32 48, %s656_s12 }
   0xe   : > { %s517_s20 = smul.u32 24, %s656_s12 }
   0xf   : > { %s614_s19 = scalar_lea.vmem %s648_s1, %s516_s16  ;;  %s515_s24 = smul.u32 12, %s656_s12 }
  0x10   : > { %v496_v1 = vld [vmem:[%s614_s19 + $0x28] sm:$0xf]  ;;  %v508_v2 = vld [vmem:[%s614_s19 + $0x28] sm:$0x10]  ;;  %s233_s23 = scalar_lea.vmem %s649_s2, %s517_s20  ;;  %v507_v7 = vld [vmem:[%s614_s19 + $0x20] sm:$0xff]  ;;  %s241_s30 = scalar_lea.vmem %s650_s3, %s517_s20 }
  0x11   : > { %v497_v3 = vor.u32 %v508_v2, %v496_v1  ;;  %v258_v5 = vld [vmem:[%s233_s23] sm:$0xff]  ;;  %v260_v6 = vld [vmem:[%s233_s23 + $0x10] sm:$0xf]  ;;  %v506_v8 = vld [vmem:[%s614_s19 + $0x18] sm:$0xff]  ;;  %s220_s27 = scalar_lea.vmem %s647_s0, %s515_s24 }
  0x12   : > { %263 = vperm.xlu0 %543, %v258_v5   ;;  %273 = vperm.xlu1 %544, %v260_v6   ;;  %v259_v9 = vld [vmem:[%s233_s23 + $0x8] sm:$0xff]  ;;  %v505_v10 = vld [vmem:[%s614_s19 + $0x10] sm:$0xff]  ;;  %v503_v14 = vld [vmem:[%s614_s19] sm:$0xff] }
  0x13   : > { %v328_v4 = vsel %vm326_vm0, %v497_v3, 0  ;;  %v504_v11 = vld [vmem:[%s614_s19 + $0x8] sm:$0xff]  ;;  %v502_v15 = vld [vmem:[%s220_s27] sm:$0xff] }
  0x14   : > { %332 = vmatpush.bf16.msra.mxu0 %v328_v4  ;;  %509 = vmatpush.bf16.msra.mxu1 %v328_v4  ;;  %v245_v12 = vld [vmem:[%s220_s27 + $0x8] sm:$0x3] }
  0x15   : > { %v281_v13 = vunpack.c.l.b16 %v245_v12 }
  0x17   : > { %v283_v16 = vpack.c.b16 %v281_v13, %v281_v13 }
  0x18   : > { %333 = vmatpush.bf16.msra.mxu0 %v507_v7  ;;  %510 = vmatpush.bf16.msra.mxu1 %v507_v7 }
  0x1a   : > { %268 = vperm.xlu0 %543, %v259_v9  }
  0x1c   : > { %334 = vmatpush.bf16.msra.mxu0 %v506_v8  ;;  %511 = vmatpush.bf16.msra.mxu1 %v506_v8 }
  0x20   : > { %335 = vmatpush.bf16.msra.mxu0 %v505_v10  ;;  %512 = vmatpush.bf16.msra.mxu1 %v505_v10 }
  0x24   : > { %336 = vmatpush.bf16.msra.mxu0 %v504_v11  ;;  %513 = vmatpush.bf16.msra.mxu1 %v504_v11 }
  0x28   : > { %337 = vmatpush.bf16.msra.mxu0 %v503_v14  ;;  %514 = vmatpush.bf16.msra.mxu1 %v503_v14 }
  0x2b   : > { %498 = vmatmul.msk.bf16.vlgmr.msra.gmra.mxu0 %vm319_vm1, %v502_v15  ;;  %499 = vmatmul.msk.bf16.vlgmr.msra.gmra.mxu1 %vm319_vm1, %v283_v16 }
  0x84   : > { %v264_v17 = vpop.permute.xlu0 %263  ;;  %v274_v18 = vpop.permute.xlu1 %273 }
  0x8c   : > { %v269_v25 = vpop.permute.xlu0 %268 }
  0xa8   : > { %v339_v19 = vpop.f32.mrf.mxu0  ;;  %v344_v20 = vpop.f32.mrf.mxu1 }
  0xa9   : > { %v340_v21 = vadd.f32 %v339_v19, %v264_v17  ;;  %v345_v22 = vadd.f32 %v344_v20, %v274_v18 }
  0xab   : > { %v348_v23 = vmax.f32 %v340_v21, 0.0  ;;  %v350_v24 = vmax.f32 %v345_v22, 0.0 }
  0xad   : > { %351 = vst [vmem:[%s241_s30] sm:$0xff] %v348_v23 }
  0xae   : > { %353 = vst [vmem:[%s241_s30 + $0x10] sm:$0xf] %v350_v24 }
  0xb0   : > { %v341_v26 = vpop.f32.mrf.mxu0  ;;  %v346_v27 = vpop.f32.mrf.mxu1 }
  0xb1   : > { %v342_v28 = vadd.f32 %v341_v26, %v269_v25 }
  0xb3   : > { %v349_v29 = vmax.f32 %v342_v28, 0.0 }
  0xb5   : > { %352 = vst [vmem:[%s241_s30 + $0x8] sm:$0xff] %v349_v29 }
  0xb6 PF: > { %s13_s14 = sadd.s32 1, %s567_s14   ;;  %s651_s12 = smov %s563_s13 }
  0xb7   : > { %p10_p5 = scmp.ge.s32.totalorder %s13_s14, 4   ;;  %s652_s13 = smov %s654_s15 }
  0xb9   :  { %12 = sbr.rel (!%p10_p5) target bundleno = 2 (0x2), region = 68 }

// kernel: networks_forward.8
= control target key start
LH: loop header
LB: loop body
LE: loop exit
PB: predicated region body
PF: predicated region fallthrough
CT: control target
= control target key end

     0   :  { %s875_s12 = smov 0   ;;  %s877_s13 = smov 0   ;;  %s976_s0 = inlined_call_operand.vmem [shape: bf16[2,30,320], index: 0, kind: input, shape index: {}]   ;;  %s977_s1 = inlined_call_operand.vmem [shape: bf16[2,320,32], index: 1, kind: input, shape index: {}]   ;;  %s978_s2 = inlined_call_operand.vmem [shape: f32[2,30,1], index: 2, kind: input, shape index: {}]   ;;  %s979_s3 = inlined_call_operand.vmem [shape: f32[2,30,32], index: 3, kind: output, shape index: {}]  }
   0x1   :  { %s879_s14 = smov 0  }
   0x2 LB: > { %s25_s15 = sadd.s32 1, %s848_s13  ;;  %p650_p0 = scmp.ge.s32.totalorder %s852_s14, 1  ;;  %s852_s14 = sphi %s879_s14, %s13_s14   ;;  %s848_s13 = sphi %s877_s13, %s981_s13   ;;  %s844_s12 = sphi %s875_s12, %s980_s12  }
   0x3   : > { %p27_p1 = scmp.ge.s32.totalorder %s25_s15, 2  ;;  %p176_p2 = scmp.lt.s32.totalorder %s852_s14, 3 }
   0x5   : > { %s983_s15 = smov (%p27_p1, %s25_s15), 0  ;;  %p177_p3 = pnand %p650_p0, %p176_p2 }
   0x6   : > { %p216_p4 = scmp.lt.s32.totalorder (!%p177_p3), %s844_s12, 1 }
   0x7   : > { %180 = sbr.rel (%p177_p3) target bundleno = 206 (0xce), region = 32 }
   0xc   : > { %s985_s12 = smov (!%p216_p4, %s844_s12), 1  ;;  %v854_v6 = vmov 0   ;;  %vm465_vm0 = vcmask 523264   ;;  %vm533_vm1 = vcmask 261120   ;;  %vm537_vm2 = vcmask 259072  }
   0xd   : > { %s802_s16 = smul.u32 160, %s985_s12  ;;  %828 = vset.pattern.permute.xlu0 %v854_v6  ;;  %s765_s20 = sshll.u32 %s985_s12, 5  ;;  %829 = vset.pattern.permute.xlu1 %v854_v6 }
   0xe   : > { %s801_s21 = smul.u32 48, %s985_s12  ;;  %s917_s24 = scalar_lea.vmem %s978_s2, %s765_s20 }
   0xf   : > { %s899_s19 = scalar_lea.vmem %s977_s1, %s802_s16  ;;  %v291_v11 = vld [vmem:[%s917_s24] sm:$0xff]  ;;  %v293_v20 = vld [vmem:[%s917_s24 + $0x10] sm:$0xff]  ;;  %v292_v21 = vld [vmem:[%s917_s24 + $0x8] sm:$0xff]  ;;  %s958_s30 = scalar_lea.vmem %s979_s3, %s765_s20 }
  0x10   : > { %v780_v0 = vld [vmem:[%s899_s19 + $0x38] sm:$0xff]  ;;  %v779_v3 = vld [vmem:[%s899_s19 + $0x30] sm:$0xff]  ;;  %v778_v7 = vld [vmem:[%s899_s19 + $0x28] sm:$0xff]  ;;  %s922_s27 = scalar_lea.vmem %s976_s0, %s801_s21  ;;  %297 = vperm.xlu0 %828, %v291_v11   ;;  %307 = vperm.xlu1 %829, %v293_v20  }
  0x11   : > { %v788_v1 = vld [vmem:[%s899_s19 + $0x78] sm:$0xff]  ;;  %472 = vmatpush.bf16.msra.mxu0 %v780_v0  ;;  %793 = vmatpush.bf16.msra.mxu3 %v780_v0  ;;  %v787_v4 = vld [vmem:[%s899_s19 + $0x70] sm:$0xff]  ;;  %v786_v8 = vld [vmem:[%s899_s19 + $0x68] sm:$0xff] }
  0x12   : > { %v792_v2 = vld [vmem:[%s899_s19 + $0x98] sm:$0xff]  ;;  %491 = vmatpush.bf16.msra.mxu1 %v788_v1  ;;  %v791_v5 = vld [vmem:[%s899_s19 + $0x90] sm:$0xff]  ;;  %v790_v9 = vld [vmem:[%s899_s19 + $0x88] sm:$0xff] }
  0x13   : > { %514 = vmatpush.bf16.msra.mxu2 %v792_v2  ;;  %v777_v10 = vld [vmem:[%s899_s19 + $0x20] sm:$0xff]  ;;  %v667_v14 = vld [vmem:[%s922_s27 + $0x8] sm:$0xf]  ;;  %v769_v15 = vld [vmem:[%s922_s27 + $0x10] sm:$0xf0] }
  0x14   : > { %v785_v12 = vld [vmem:[%s899_s19 + $0x60] sm:$0xff]  ;;  %v776_v16 = vld [vmem:[%s899_s19 + $0x18] sm:$0xff]  ;;  %v668_v18 = vor.u32 %v769_v15, %v667_v14  ;;  %v775_v19 = vld [vmem:[%s899_s19 + $0x10] sm:$0xff] }
  0x15   : > { %473 = vmatpush.bf16.msra.mxu0 %v779_v3  ;;  %794 = vmatpush.bf16.msra.mxu3 %v779_v3  ;;  %v789_v13 = vld [vmem:[%s899_s19 + $0x80] sm:$0xff]  ;;  %v784_v17 = vld [vmem:[%s899_s19 + $0x58] sm:$0xff]  ;;  %v783_v22 = vld [vmem:[%s899_s19 + $0x50] sm:$0xff] }
  0x16   : > { %492 = vmatpush.bf16.msra.mxu1 %v787_v4  ;;  %v774_v23 = vld [vmem:[%s899_s19 + $0x8] sm:$0xff]  ;;  %v773_v25 = vld [vmem:[%s899_s19] sm:$0xff]  ;;  %v294_v27 = vld [vmem:[%s917_s24 + $0x18] sm:$0x3f] }
  0x17   : > { %515 = vmatpush.bf16.msra.mxu2 %v791_v5  ;;  %v782_v24 = vld [vmem:[%s899_s19 + $0x48] sm:$0xff]  ;;  %v659_v26 = vld [vmem:[%s922_s27] sm:$0xf]  ;;  %v671_v29 = vld [vmem:[%s922_s27 + $0x18] sm:$0xf] }
  0x18   : > { %302 = vperm.xlu0 %828, %v292_v21   ;;  %v768_v28 = vld [vmem:[%s922_s27 + $0x8] sm:$0xf0]  ;;  %v771_v30 = vld [vmem:[%s922_s27 + $0x20] sm:$0x70]  ;;  %v661_v33 = vld [vmem:[%s922_s27 + $0xc] sm:$0xf0]  ;;  %312 = vperm.xlu1 %829, %v294_v27  }
  0x19   : > { %474 = vmatpush.bf16.msra.mxu0 %v778_v7  ;;  %795 = vmatpush.bf16.msra.mxu3 %v778_v7  ;;  %v781_v31 = vld [vmem:[%s899_s19 + $0x40] sm:$0xff]  ;;  %v772_v35 = vld [vmem:[%s922_s27 + $0x28] sm:$0x70]  ;;  %v660_v36 = vor.u32 %v768_v28, %v659_v26  ;;  %v672_v37 = vor.u32 %v771_v30, %v671_v29  ;;  %v770_v40 = vld [vmem:[%s922_s27 + $0x1c] sm:$0xf] }
  0x1a   : > { %493 = vmatpush.bf16.msra.mxu1 %v786_v8  ;;  %v767_v32 = vld [vmem:[%s922_s27 + $0x4] sm:$0xf]  ;;  %v679_v34 = vld [vmem:[%s922_s27 + $0x20] sm:$0xf]  ;;  %v673_v41 = vld [vmem:[%s922_s27 + $0x24] sm:$0x70] }
  0x1b   : > { %516 = vmatpush.bf16.msra.mxu2 %v790_v9  ;;  %v664_v38 = vor.u32 %v767_v32, %v661_v33  ;;  %v680_v39 = vor.u32 %v772_v35, %v679_v34  ;;  %v676_v42 = vor.u32 %v770_v40, %v673_v41 }
  0x1d   : > { %475 = vmatpush.bf16.msra.mxu0 %v777_v10  ;;  %796 = vmatpush.bf16.msra.mxu3 %v777_v10 }
  0x1e   : > { %494 = vmatpush.bf16.msra.mxu1 %v785_v12 }
  0x1f   : > { %517 = vmatpush.bf16.msra.mxu2 %v789_v13 }
  0x21   : > { %476 = vmatpush.bf16.msra.mxu0 %v776_v16  ;;  %797 = vmatpush.bf16.msra.mxu3 %v776_v16 }
  0x22   : > { %495 = vmatpush.bf16.msra.mxu1 %v784_v17  ;;  %761 = vmatmul.msk.bf16.vlgmr.msra.gmra.mxu2 %vm465_vm0, %v668_v18 }
  0x25   : > { %477 = vmatpush.bf16.msra.mxu0 %v775_v19  ;;  %798 = vmatpush.bf16.msra.mxu3 %v775_v19 }
  0x26   : > { %496 = vmatpush.bf16.msra.mxu1 %v783_v22 }
  0x29   : > { %478 = vmatpush.bf16.msra.mxu0 %v774_v23  ;;  %799 = vmatpush.bf16.msra.mxu3 %v774_v23 }
  0x2a   : > { %497 = vmatpush.bf16.msra.mxu1 %v782_v24 }
  0x2d   : > { %479 = vmatpush.bf16.msra.mxu0 %v773_v25  ;;  %800 = vmatpush.bf16.msra.mxu3 %v773_v25 }
  0x2e   : > { %498 = vmatpush.bf16.msra.mxu1 %v781_v31 }
  0x30   : > { %480 = vmatmul.bf16.vlgmr.msra.gmra.mxu0 %v660_v36  ;;  %485 = vmatmul.bf16.vlgmr.msra.gmra.mxu3 %v672_v37 }
  0x31   : > { %499 = vmatmul.bf16.vlgmr.msra.gmra.mxu1 %v664_v38 }
  0x32   : > { %762 = vmatmul.msk.bf16.gmra.mxu2 %vm465_vm0, %v680_v39 }
  0x41   : > { %504 = vmatmul.bf16.gmra.mxu1 %v676_v42 }
  0x82   : > { %v298_v43 = vpop.permute.xlu0 %297  ;;  %v308_v56 = vpop.permute.xlu1 %307 }
  0x8a   : > { %v303_v50 = vpop.permute.xlu0 %302  ;;  %v313_v2 = vpop.permute.xlu1 %312 }
  0xa5   : > { %v519_v44 = vpop.f32.mrf.mxu2 }
  0xad   : > { %v481_v45 = vpop.f32.mrf.mxu0  ;;  %v521_v52 = vpop.f32.mrf.mxu2 }
  0xae   : > { %v482_v46 = vadd.f32 %v481_v45, %v298_v43  ;;  %v500_v47 = vpop.f32.mrf.mxu1 }
  0xb0   : > { %v501_v48 = vadd.f32 %v500_v47, %v482_v46 }
  0xb2   : > { %v520_v49 = vadd.f32 %v519_v44, %v501_v48 }
  0xb3   : > { %v486_v57 = vpop.f32.mrf.mxu3 }
  0xb4   : > { %v529_v51 = vmax.f32 %v520_v49, 0.0  ;;  %v487_v60 = vadd.f32 %v486_v57, %v308_v56 }
  0xb5   : > { %v483_v53 = vpop.f32.mrf.mxu0  ;;  %v524_v62 = vpop.f32.mrf.mxu2 }
  0xb6   : > { %534 = vst.msk [vmem:[%s958_s30] sm:$0xff] %vm533_vm1, %v529_v51  ;;  %v484_v54 = vadd.f32 %v483_v53, %v303_v50  ;;  %v502_v55 = vpop.f32.mrf.mxu1 }
  0xb8   : > { %v503_v58 = vadd.f32 %v502_v55, %v484_v54 }
  0xba   : > { %v522_v59 = vadd.f32 %v521_v52, %v503_v58 }
  0xbb   : > { %v488_v3 = vpop.f32.mrf.mxu3 }
  0xbc   : > { %v530_v61 = vmax.f32 %v522_v59, 0.0  ;;  %v489_v5 = vadd.f32 %v488_v3, %v313_v2 }
  0xbd   : > { %v526_v8 = vpop.f32.mrf.mxu2 }
  0xbe   : > { %535 = vst.msk [vmem:[%s958_s30 + $0x8] sm:$0xff] %vm533_vm1, %v530_v61  ;;  %v505_v63 = vpop.f32.mrf.mxu1 }
  0xbf   : > { %v506_v0 = vadd.f32 %v505_v63, %v487_v60 }
  0xc1   : > { %v525_v1 = vadd.f32 %v524_v62, %v506_v0 }
  0xc3   : > { %v531_v4 = vmax.f32 %v525_v1, 0.0 }
  0xc5   : > { %536 = vst.msk [vmem:[%s958_s30 + $0x10] sm:$0xff] %vm533_vm1, %v531_v4 }
  0xc6   : > { %v507_v6 = vpop.f32.mrf.mxu1 }
  0xc7   : > { %v508_v7 = vadd.f32 %v507_v6, %v489_v5 }
  0xc9   : > { %v527_v9 = vadd.f32 %v526_v8, %v508_v7 }
  0xcb   : > { %v532_v10 = vmax.f32 %v527_v9, 0.0 }
  0xcd   : > { %538 = vst.msk [vmem:[%s958_s30 + $0x18] sm:$0x3f] %vm537_vm2, %v532_v10 }
  0xce PF: > { %s13_s14 = sadd.s32 1, %s852_s14   ;;  %s980_s12 = smov %s848_s13 }
  0xcf   : > { %p10_p5 = scmp.ge.s32.totalorder %s13_s14, 4   ;;  %s981_s13 = smov %s983_s15 }
  0xd1   :  { %12 = sbr.rel (!%p10_p5) target bundleno = 2 (0x2), region = 68 }

// kernel: networks_forward.9
= control target key start
LH: loop header
LB: loop body
LE: loop exit
PB: predicated region body
PF: predicated region fallthrough
CT: control target
= control target key end

     0   :  { %s1051_s12 = smov 0   ;;  %s1053_s13 = smov 0   ;;  %s1206_s0 = inlined_call_operand.vmem [shape: bf16[2,80,270], index: 0, kind: input, shape index: {}]   ;;  %s1207_s1 = inlined_call_operand.vmem [shape: bf16[2,270,32], index: 1, kind: input, shape index: {}]   ;;  %s1208_s2 = inlined_call_operand.vmem [shape: f32[2,80,1], index: 2, kind: input, shape index: {}]   ;;  %s1209_s3 = inlined_call_operand.vmem [shape: f32[2,80,32], index: 3, kind: output, shape index: {}]  }
   0x1   :  { %s1055_s14 = smov 0  }
   0x2 LB: > { %s25_s15 = sadd.s32 1, %s1024_s13  ;;  %p787_p0 = scmp.ge.s32.totalorder %s1028_s14, 1  ;;  %s1028_s14 = sphi %s1055_s14, %s13_s14   ;;  %s1024_s13 = sphi %s1053_s13, %s1211_s13   ;;  %s1020_s12 = sphi %s1051_s12, %s1210_s12  }
   0x3   : > { %p27_p1 = scmp.ge.s32.totalorder %s25_s15, 2  ;;  %p176_p2 = scmp.lt.s32.totalorder %s1028_s14, 3 }
   0x5   : > { %s1213_s15 = smov (%p27_p1, %s25_s15), 0  ;;  %p177_p3 = pnand %p787_p0, %p176_p2 }
   0x6   : > { %p216_p4 = scmp.lt.s32.totalorder (!%p177_p3), %s1020_s12, 1 }
   0x7   : > { %180 = sbr.rel (%p177_p3) target bundleno = 245 (0xf5), region = 32 }
   0xc   : > { %s1215_s12 = smov (!%p216_p4, %s1020_s12), 1  ;;  %vm549_vm0 = vcmask 1046528   ;;  %vm533_vm1 = vcmask 113664   ;;  %v1030_v17 = vmov 0   ;;  %vm665_vm2 = vcmask 261120  }
   0xd   : > { %s976_s16 = smul.u32 136, %s1215_s12  ;;  %1004 = vset.pattern.permute.xlu1 %v1030_v17  ;;  %1003 = vset.pattern.permute.xlu0 %v1030_v17 }
   0xe   : > { %s975_s17 = smul.u32 120, %s1215_s12  ;;  %1005 = vset.pattern.permute.xlu2 %v1030_v17 }
   0xf   : > { %s1076_s20 = scalar_lea.vmem %s1207_s1, %s976_s16  ;;  %s977_s24 = smul.u32 80, %s1215_s12 }
  0x10   : > { %v949_v0 = vld [vmem:[%s1076_s20 + $0x38] sm:$0xff]  ;;  %s1085_s23 = scalar_lea.vmem %s1206_s0, %s975_s17  ;;  %v948_v2 = vld [vmem:[%s1076_s20 + $0x30] sm:$0xff]  ;;  %v918_v3 = vld [vmem:[%s1076_s20 + $0x80] sm:$0xf] }
  0x11   : > { %v1080_v1 = vld [vmem:[%s1076_s20 + $0x78] sm:$0xff]  ;;  %553 = vmatpush.bf16.msra.mxu0 %v949_v0  ;;  %959 = vmatpush.bf16.msra.mxu3 %v949_v0  ;;  %v958_v4 = vld [vmem:[%s1076_s20 + $0x80] sm:$0x70]  ;;  %v1092_v5 = vld [vmem:[%s1076_s20 + $0x70] sm:$0xff]  ;;  %s1115_s27 = scalar_lea.vmem %s1208_s2, %s977_s24  ;;  %s1175_s30 = scalar_lea.vmem %s1209_s3, %s977_s24 }
  0x12   : > { %967 = vmatpush.bf16.msra.mxu1 %v1080_v1  ;;  %v919_v6 = vor.u32 %v958_v4, %v918_v3  ;;  %v802_v7 = vld [vmem:[%s1085_s23 + $0x8] sm:$0xf]  ;;  %v929_v8 = vld [vmem:[%s1085_s23 + $0x10] sm:$0xf0]  ;;  %v946_v13 = vld [vmem:[%s1076_s20 + $0x20] sm:$0xff] }
  0x13   : > { %v947_v10 = vld [vmem:[%s1076_s20 + $0x28] sm:$0xff]  ;;  %v803_v12 = vor.u32 %v929_v8, %v802_v7  ;;  %v954_v14 = vld [vmem:[%s1076_s20 + $0x60] sm:$0xff]  ;;  %v945_v15 = vld [vmem:[%s1076_s20 + $0x18] sm:$0xff] }
  0x14   : > { %v551_v9 = vsel %vm549_vm0, %v919_v6, 0  ;;  %v1099_v11 = vld [vmem:[%s1076_s20 + $0x68] sm:$0xff]  ;;  %v1108_v16 = vld [vmem:[%s1076_s20 + $0x58] sm:$0xff]  ;;  %v944_v18 = vld [vmem:[%s1076_s20 + $0x10] sm:$0xff] }
  0x15   : > { %554 = vmatpush.bf16.msra.mxu0 %v948_v2  ;;  %960 = vmatpush.bf16.msra.mxu3 %v948_v2  ;;  %v299_v19 = vld [vmem:[%s1115_s27 + $0x10] sm:$0xff]  ;;  %v814_v21 = vld [vmem:[%s1085_s23 + $0x20] sm:$0xf]  ;;  %v932_v22 = vld [vmem:[%s1085_s23 + $0x28] sm:$0xf0] }
  0x16   : > { %968 = vmatpush.bf16.msra.mxu1 %v1092_v5  ;;  %628 = vmatpush.bf16.msra.mxu2 %v551_v9  ;;  %v952_v20 = vld [vmem:[%s1076_s20 + $0x50] sm:$0xff]  ;;  %v943_v23 = vld [vmem:[%s1076_s20 + $0x8] sm:$0xff]  ;;  %v815_v25 = vor.u32 %v932_v22, %v814_v21  ;;  %v297_v26 = vld [vmem:[%s1115_s27] sm:$0xff] }
  0x17   : > { %319 = vperm.xlu1 %1004, %v299_v19   ;;  %v951_v24 = vld [vmem:[%s1076_s20 + $0x48] sm:$0xff]  ;;  %309 = vperm.xlu0 %1003, %v297_v26   ;;  %v942_v27 = vld [vmem:[%s1076_s20] sm:$0xff]  ;;  %v806_v28 = vld [vmem:[%s1085_s23 + $0x18] sm:$0xf] }
  0x18   : > { %v300_v29 = vld [vmem:[%s1115_s27 + $0x18] sm:$0xff]  ;;  %v931_v30 = vld [vmem:[%s1085_s23 + $0x20] sm:$0xf0]  ;;  %v794_v31 = vld [vmem:[%s1085_s23] sm:$0xf] }
  0x19   : > { %555 = vmatpush.bf16.msra.mxu0 %v947_v10  ;;  %961 = vmatpush.bf16.msra.mxu3 %v947_v10  ;;  %v928_v32 = vld [vmem:[%s1085_s23 + $0x8] sm:$0xf0]  ;;  %v950_v33 = vld [vmem:[%s1076_s20 + $0x40] sm:$0xff]  ;;  %v930_v34 = vld [vmem:[%s1085_s23 + $0x1c] sm:$0xf]  ;;  %v807_v36 = vor.u32 %v931_v30, %v806_v28 }
  0x1a   : > { %969 = vmatpush.bf16.msra.mxu1 %v1099_v11  ;;  %920 = vmatmul.msk.bf16.vlgmr.msra.gmra.mxu2 %vm533_vm1, %v803_v12  ;;  %v808_v35 = vld [vmem:[%s1085_s23 + $0x24] sm:$0xf0]  ;;  %v795_v37 = vor.u32 %v928_v32, %v794_v31  ;;  %v826_v40 = vld [vmem:[%s1085_s23 + $0x38] sm:$0xf]  ;;  %v935_v41 = vld [vmem:[%s1085_s23 + $0x40] sm:$0xf0] }
  0x1b   : > { %v811_v38 = vor.u32 %v930_v34, %v808_v35  ;;  %v298_v39 = vld [vmem:[%s1115_s27 + $0x8] sm:$0xff]  ;;  %v827_v42 = vor.u32 %v935_v41, %v826_v40  ;;  %v303_v43 = vld [vmem:[%s1115_s27 + $0x30] sm:$0xff]  ;;  %v934_v45 = vld [vmem:[%s1085_s23 + $0x38] sm:$0xf0] }
  0x1c   : > { %v818_v44 = vld [vmem:[%s1085_s23 + $0x30] sm:$0xf]  ;;  %v933_v46 = vld [vmem:[%s1085_s23 + $0x34] sm:$0xf]  ;;  %v820_v47 = vld [vmem:[%s1085_s23 + $0x3c] sm:$0xf0] }
  0x1d   : > { %556 = vmatpush.bf16.msra.mxu0 %v946_v13  ;;  %962 = vmatpush.bf16.msra.mxu3 %v946_v13  ;;  %v819_v48 = vor.u32 %v934_v45, %v818_v44  ;;  %v823_v49 = vor.u32 %v933_v46, %v820_v47  ;;  %v306_v50 = vld [vmem:[%s1115_s27 + $0x48] sm:$0xff]  ;;  %v301_v51 = vld [vmem:[%s1115_s27 + $0x20] sm:$0xff]  ;;  %v304_v52 = vld [vmem:[%s1115_s27 + $0x38] sm:$0xff] }
  0x1e   : > { %970 = vmatpush.bf16.msra.mxu1 %v954_v14  ;;  %329 = vperm.xlu2 %1005, %v301_v51   ;;  %v838_v53 = vld [vmem:[%s1085_s23 + $0x50] sm:$0xf]  ;;  %v938_v54 = vld [vmem:[%s1085_s23 + $0x58] sm:$0xf0]  ;;  %v927_v56 = vld [vmem:[%s1085_s23 + $0x4] sm:$0xf] }
  0x1f   : > { %324 = vperm.xlu1 %1004, %v300_v29   ;;  %314 = vperm.xlu0 %1003, %v298_v39   ;;  %v839_v55 = vor.u32 %v938_v54, %v838_v53  ;;  %v796_v57 = vld [vmem:[%s1085_s23 + $0xc] sm:$0xf0]  ;;  %v302_v58 = vld [vmem:[%s1115_s27 + $0x28] sm:$0xff]  ;;  %v937_v61 = vld [vmem:[%s1085_s23 + $0x50] sm:$0xf0] }
  0x20   : > { %v799_v59 = vor.u32 %v927_v56, %v796_v57  ;;  %v830_v60 = vld [vmem:[%s1085_s23 + $0x48] sm:$0xf]  ;;  %v936_v62 = vld [vmem:[%s1085_s23 + $0x4c] sm:$0xf]  ;;  %v832_v63 = vld [vmem:[%s1085_s23 + $0x54] sm:$0xf0] }
  0x21   : > { %557 = vmatpush.bf16.msra.mxu0 %v945_v15  ;;  %963 = vmatpush.bf16.msra.mxu3 %v945_v15  ;;  %v831_v0 = vor.u32 %v937_v61, %v830_v60  ;;  %v305_v2 = vld [vmem:[%s1115_s27 + $0x40] sm:$0xff]  ;;  %v850_v3 = vld [vmem:[%s1085_s23 + $0x68] sm:$0xf]  ;;  %v941_v4 = vld [vmem:[%s1085_s23 + $0x70] sm:$0xf0] }
  0x22   : > { %971 = vmatpush.bf16.msra.mxu1 %v1108_v16  ;;  %v842_v6 = vld [vmem:[%s1085_s23 + $0x60] sm:$0xf]  ;;  %v940_v7 = vld [vmem:[%s1085_s23 + $0x68] sm:$0xf0]  ;;  %v939_v8 = vld [vmem:[%s1085_s23 + $0x64] sm:$0xf] }
  0x23   : > { %v844_v9 = vld [vmem:[%s1085_s23 + $0x6c] sm:$0xf0]  ;;  %v843_v10 = vor.u32 %v940_v7, %v842_v6 }
  0x25   : > { %558 = vmatpush.bf16.msra.mxu0 %v944_v18  ;;  %964 = vmatpush.bf16.msra.mxu3 %v944_v18 }
  0x26   : > { %972 = vmatpush.bf16.msra.mxu1 %v952_v20  ;;  %334 = vperm.xlu2 %1005, %v302_v58  }
  0x27   : > { %339 = vperm.xlu0 %1003, %v303_v43   ;;  %344 = vperm.xlu1 %1004, %v304_v52  }
  0x29   : > { %559 = vmatpush.bf16.msra.mxu0 %v943_v23  ;;  %965 = vmatpush.bf16.msra.mxu3 %v943_v23 }
  0x2a   : > { %973 = vmatpush.bf16.msra.mxu1 %v951_v24  ;;  %921 = vmatmul.msk.bf16.gmra.mxu2 %vm533_vm1, %v815_v25 }
  0x2d   : > { %560 = vmatpush.bf16.msra.mxu0 %v942_v27  ;;  %966 = vmatpush.bf16.msra.mxu3 %v942_v27 }
  0x2e   : > { %974 = vmatpush.bf16.msra.mxu1 %v950_v33  ;;  %349 = vperm.xlu2 %1005, %v305_v2  }
  0x2f   : > { %354 = vperm.xlu0 %1003, %v306_v50  }
  0x30   : > { %566 = vmatmul.bf16.vlgmr.msra.gmra.mxu3 %v807_v36  ;;  %561 = vmatmul.bf16.vlgmr.msra.gmra.mxu0 %v795_v37 }
  0x31   : > { %587 = vmatpush.bf16.msrb.mxu0 %v1080_v1  ;;  %600 = vmatmul.bf16.vlgmr.msra.gmra.mxu1 %v811_v38  ;;  %v835_v1 = vor.u32 %v936_v62, %v832_v63 }
  0x35   : > { %588 = vmatpush.bf16.msrb.mxu0 %v1092_v5  ;;  %v851_v5 = vor.u32 %v941_v4, %v850_v3 }
  0x39   : > { %589 = vmatpush.bf16.msrb.mxu0 %v1099_v11  ;;  %v847_v11 = vor.u32 %v939_v8, %v844_v9 }
  0x3a   : > { %922 = vmatmul.msk.bf16.gmra.mxu2 %vm533_vm1, %v827_v42 }
  0x3d   : > { %590 = vmatpush.bf16.msrb.mxu0 %v954_v14 }
  0x40   : > { %571 = vmatmul.bf16.gmra.mxu3 %v819_v48 }
  0x41   : > { %591 = vmatpush.bf16.msrb.mxu0 %v1108_v16  ;;  %605 = vmatmul.bf16.gmra.mxu1 %v823_v49 }
  0x45   : > { %592 = vmatpush.bf16.msrb.mxu0 %v952_v20 }
  0x49   : > { %593 = vmatpush.bf16.msrb.mxu0 %v951_v24 }
  0x4a   : > { %923 = vmatmul.msk.bf16.gmra.mxu2 %vm533_vm1, %v839_v55 }
  0x4d   : > { %594 = vmatpush.bf16.msrb.mxu0 %v950_v33 }
  0x50   : > { %595 = vmatmul.bf16.vlgmr.msrb.gmra.mxu0 %v799_v59  ;;  %576 = vmatmul.bf16.gmra.mxu3 %v831_v0 }
  0x51   : > { %610 = vmatmul.bf16.gmra.mxu1 %v835_v1 }
  0x5a   : > { %924 = vmatmul.msk.bf16.gmra.mxu2 %vm533_vm1, %v851_v5 }
  0x60   : > { %581 = vmatmul.bf16.gmra.mxu3 %v843_v10 }
  0x61   : > { %615 = vmatmul.bf16.gmra.mxu1 %v847_v11 }
  0x78   : > { %v330_v32 = vpop.permute.xlu2 %329 }
  0x80   : > { %v335_v44 = vpop.permute.xlu2 %334 }
  0x88   : > { %v350_v11 = vpop.permute.xlu2 %349 }
  0x89   : > { %v320_v16 = vpop.permute.xlu1 %319  ;;  %v310_v31 = vpop.permute.xlu0 %309 }
  0x91   : > { %v325_v24 = vpop.permute.xlu1 %324  ;;  %v315_v43 = vpop.permute.xlu0 %314 }
  0x99   : > { %v340_v59 = vpop.permute.xlu0 %339  ;;  %v345_v4 = vpop.permute.xlu1 %344 }
  0x9d   : > { %v630_v12 = vpop.f32.mrf.mxu2 }
  0xa5   : > { %v632_v13 = vpop.f32.mrf.mxu2 }
  0xad   : > { %v635_v14 = vpop.f32.mrf.mxu2  ;;  %v562_v22 = vpop.f32.mrf.mxu0 }
  0xae   : > { %v601_v15 = vpop.f32.mrf.mxu1  ;;  %v563_v40 = vadd.f32 %v562_v22, %v310_v31 }
  0xb3   : > { %v567_v17 = vpop.f32.mrf.mxu3 }
  0xb4   : > { %v568_v18 = vadd.f32 %v567_v17, %v320_v16 }
  0xb5   : > { %v637_v19 = vpop.f32.mrf.mxu2  ;;  %v564_v34 = vpop.f32.mrf.mxu0 }
  0xb6   : > { %v602_v20 = vadd.f32 %v601_v15, %v568_v18  ;;  %v603_v21 = vpop.f32.mrf.mxu1  ;;  %v565_v52 = vadd.f32 %v564_v34, %v315_v43 }
  0xb8   : > { %v636_v23 = vadd.f32 %v635_v14, %v602_v20  ;;  %v355_v20 = vpop.permute.xlu0 %354 }
  0xba   : > { %v657_v25 = vmax.f32 %v636_v23, 0.0 }
  0xbb   : > { %v569_v26 = vpop.f32.mrf.mxu3 }
  0xbc   : > { %668 = vst.msk [vmem:[%s1175_s30 + $0x10] sm:$0xff] %vm665_vm2, %v657_v25  ;;  %v570_v27 = vadd.f32 %v569_v26, %v325_v24 }
  0xbd   : > { %v640_v28 = vpop.f32.mrf.mxu2 }
  0xbe   : > { %v604_v29 = vadd.f32 %v603_v21, %v570_v27  ;;  %v606_v30 = vpop.f32.mrf.mxu1 }
  0xc0   : > { %v638_v33 = vadd.f32 %v637_v19, %v604_v29 }
  0xc2   : > { %v658_v35 = vmax.f32 %v638_v33, 0.0 }
  0xc3   : > { %v572_v36 = vpop.f32.mrf.mxu3 }
  0xc4   : > { %669 = vst.msk [vmem:[%s1175_s30 + $0x18] sm:$0xff] %vm665_vm2, %v658_v35  ;;  %v573_v37 = vadd.f32 %v572_v36, %v330_v32 }
  0xc5   : > { %v642_v41 = vpop.f32.mrf.mxu2 }
  0xc6   : > { %v607_v38 = vadd.f32 %v606_v30, %v573_v37  ;;  %v608_v39 = vpop.f32.mrf.mxu1 }
  0xc8   : > { %v641_v42 = vadd.f32 %v640_v28, %v607_v38 }
  0xca   : > { %v659_v45 = vmax.f32 %v641_v42, 0.0 }
  0xcb   : > { %v574_v48 = vpop.f32.mrf.mxu3 }
  0xcc   : > { %670 = vst.msk [vmem:[%s1175_s30 + $0x20] sm:$0xff] %vm665_vm2, %v659_v45  ;;  %v575_v49 = vadd.f32 %v574_v48, %v335_v44 }
  0xcd   : > { %v596_v46 = vpop.f32.mrf.mxu0  ;;  %v645_v56 = vpop.f32.mrf.mxu2 }
  0xce   : > { %v597_v47 = vadd.f32 %v596_v46, %v563_v40  ;;  %v609_v51 = vadd.f32 %v608_v39, %v575_v49  ;;  %v611_v54 = vpop.f32.mrf.mxu1 }
  0xd0   : > { %v631_v50 = vadd.f32 %v630_v12, %v597_v47  ;;  %v643_v55 = vadd.f32 %v642_v41, %v609_v51 }
  0xd2   : > { %v655_v53 = vmax.f32 %v631_v50, 0.0  ;;  %v660_v57 = vmax.f32 %v643_v55, 0.0 }
  0xd3   : > { %v577_v61 = vpop.f32.mrf.mxu3 }
  0xd4   : > { %666 = vst.msk [vmem:[%s1175_s30] sm:$0xff] %vm665_vm2, %v655_v53  ;;  %v578_v62 = vadd.f32 %v577_v61, %v340_v59 }
  0xd5   : > { %v598_v58 = vpop.f32.mrf.mxu0  ;;  %671 = vst.msk [vmem:[%s1175_s30 + $0x28] sm:$0xff] %vm665_vm2, %v660_v57  ;;  %v647_v6 = vpop.f32.mrf.mxu2 }
  0xd6   : > { %v599_v60 = vadd.f32 %v598_v58, %v565_v52  ;;  %v612_v0 = vadd.f32 %v611_v54, %v578_v62  ;;  %v613_v3 = vpop.f32.mrf.mxu1 }
  0xd8   : > { %v633_v63 = vadd.f32 %v632_v13, %v599_v60  ;;  %v646_v2 = vadd.f32 %v645_v56, %v612_v0 }
  0xda   : > { %v656_v1 = vmax.f32 %v633_v63, 0.0  ;;  %v661_v5 = vmax.f32 %v646_v2, 0.0 }
  0xdb   : > { %v579_v7 = vpop.f32.mrf.mxu3 }
  0xdc   : > { %667 = vst.msk [vmem:[%s1175_s30 + $0x8] sm:$0xff] %vm665_vm2, %v656_v1  ;;  %v580_v8 = vadd.f32 %v579_v7, %v345_v4 }
  0xdd   : > { %672 = vst.msk [vmem:[%s1175_s30 + $0x30] sm:$0xff] %vm665_vm2, %v661_v5  ;;  %v650_v16 = vpop.f32.mrf.mxu2 }
  0xde   : > { %v614_v9 = vadd.f32 %v613_v3, %v580_v8  ;;  %v616_v13 = vpop.f32.mrf.mxu1 }
  0xe0   : > { %v648_v10 = vadd.f32 %v647_v6, %v614_v9 }
  0xe2   : > { %v662_v12 = vmax.f32 %v648_v10, 0.0 }
  0xe3   : > { %v582_v14 = vpop.f32.mrf.mxu3 }
  0xe4   : > { %673 = vst.msk [vmem:[%s1175_s30 + $0x38] sm:$0xff] %vm665_vm2, %v662_v12  ;;  %v583_v15 = vadd.f32 %v582_v14, %v350_v11 }
  0xe5   : > { %v652_v25 = vpop.f32.mrf.mxu2 }
  0xe6   : > { %v617_v17 = vadd.f32 %v616_v13, %v583_v15  ;;  %v618_v23 = vpop.f32.mrf.mxu1 }
  0xe8   : > { %v651_v18 = vadd.f32 %v650_v16, %v617_v17 }
  0xea   : > { %v663_v19 = vmax.f32 %v651_v18, 0.0 }
  0xeb   : > { %v584_v21 = vpop.f32.mrf.mxu3 }
  0xec   : > { %674 = vst.msk [vmem:[%s1175_s30 + $0x40] sm:$0xff] %vm665_vm2, %v663_v19  ;;  %v585_v22 = vadd.f32 %v584_v21, %v355_v20 }
  0xee   : > { %v619_v24 = vadd.f32 %v618_v23, %v585_v22 }
  0xf0   : > { %v653_v26 = vadd.f32 %v652_v25, %v619_v24 }
  0xf2   : > { %v664_v27 = vmax.f32 %v653_v26, 0.0 }
  0xf4   : > { %675 = vst.msk [vmem:[%s1175_s30 + $0x48] sm:$0xff] %vm665_vm2, %v664_v27 }
  0xf5 PF: > { %s13_s14 = sadd.s32 1, %s1028_s14   ;;  %s1210_s12 = smov %s1024_s13 }
  0xf6   : > { %p10_p5 = scmp.ge.s32.totalorder %s13_s14, 4   ;;  %s1211_s13 = smov %s1213_s15 }
  0xf8   :  { %12 = sbr.rel (!%p10_p5) target bundleno = 2 (0x2), region = 68 }

// kernel: networks_forward.10
= control target key start
LH: loop header
LB: loop body
LE: loop exit
PB: predicated region body
PF: predicated region fallthrough
CT: control target
= control target key end

     0   :  { %s660_s12 = smov 0   ;;  %s662_s13 = smov 0   ;;  %s718_s0 = inlined_call_operand.vmem [shape: bf16[2,10,180], index: 0, kind: input, shape index: {}]   ;;  %s719_s1 = inlined_call_operand.vmem [shape: bf16[2,180,128], index: 1, kind: input, shape index: {}]   ;;  %s720_s2 = inlined_call_operand.vmem [shape: f32[2,10,1], index: 2, kind: input, shape index: {}]   ;;  %s721_s3 = inlined_call_operand.vmem [shape: f32[2,10,128], index: 3, kind: output, shape index: {}]  }
   0x1   :  { %s664_s14 = smov 0  }
   0x2 LB: > { %s25_s15 = sadd.s32 1, %s633_s13  ;;  %p509_p0 = scmp.ge.s32.totalorder %s637_s14, 1  ;;  %s637_s14 = sphi %s664_s14, %s13_s14   ;;  %s633_s13 = sphi %s662_s13, %s723_s13   ;;  %s629_s12 = sphi %s660_s12, %s722_s12  }
   0x3   : > { %p27_p1 = scmp.ge.s32.totalorder %s25_s15, 2  ;;  %p176_p2 = scmp.lt.s32.totalorder %s637_s14, 3 }
   0x5   : > { %s725_s15 = smov (%p27_p1, %s25_s15), 0  ;;  %p177_p3 = pnand %p509_p0, %p176_p2 }
   0x6   : > { %p216_p4 = scmp.lt.s32.totalorder (!%p177_p3), %s629_s12, 1 }
   0x7   : > { %180 = sbr.rel (%p177_p3) target bundleno = 189 (0xbd), region = 32 }
   0xc   : > { %s727_s12 = smov (!%p216_p4, %s629_s12), 1  ;;  %v639_v4 = vmov 0   ;;  %vm362_vm0 = vcmask 1041408   ;;  %vm358_vm1 = vcmask 424960  }
   0xd   : > { %s588_s16 = smul.u32 92, %s727_s12  ;;  %s684_s20 = sshll.u32 %s727_s12, 4  ;;  %614 = vset.pattern.permute.xlu0 %v639_v4 }
   0xe   : > { %s233_s23 = scalar_lea.vmem %s720_s2, %s684_s20  ;;  %s220_s26 = scalar_lea.vmem %s718_s0, %s684_s20 }
   0xf   : > { %s681_s19 = scalar_lea.vmem %s719_s1, %s588_s16  ;;  %v268_v6 = vld [vmem:[%s233_s23] sm:$0xff]  ;;  %v269_v11 = vld [vmem:[%s233_s23 + $0x8] sm:$0x3]  ;;  %v521_v16 = vld [vmem:[%s220_s26 + $0x8] sm:$0x10]  ;;  %s241_s29 = scalar_lea.vmem %s721_s3, %s684_s20 }
  0x10   : > { %v584_v0 = vld [vmem:[%s681_s19 + $0x38] sm:$0xff]  ;;  %v583_v2 = vld [vmem:[%s681_s19 + $0x30] sm:$0xff]  ;;  %272 = vperm.xlu0 %614, %v268_v6   ;;  %v582_v7 = vld [vmem:[%s681_s19 + $0x28] sm:$0xff] }
  0x11   : > { %v267_v1 = vld [vmem:[%s681_s19 + $0x58] sm:$0x3]  ;;  %366 = vmatpush.bf16.msra.mxu0 %v584_v0  ;;  %v587_v9 = vld [vmem:[%s681_s19 + $0x50] sm:$0xff]  ;;  %v581_v10 = vld [vmem:[%s681_s19 + $0x20] sm:$0xff] }
  0x12   : > { %v334_v3 = vunpack.c.l.b16 %v267_v1  ;;  %v586_v12 = vld [vmem:[%s681_s19 + $0x48] sm:$0xff]  ;;  %v580_v13 = vld [vmem:[%s681_s19 + $0x18] sm:$0xff]  ;;  %v585_v14 = vld [vmem:[%s681_s19 + $0x40] sm:$0xff] }
  0x13   : > { %v575_v15 = vld [vmem:[%s220_s26 + $0x4] sm:$0xf]  ;;  %v579_v17 = vld [vmem:[%s681_s19 + $0x10] sm:$0xff]  ;;  %v578_v19 = vld [vmem:[%s681_s19 + $0x8] sm:$0xff] }
  0x14   : > { %v346_v5 = vpack.c.b16 %v334_v3, %v334_v3  ;;  %v524_v18 = vor.u32 %v575_v15, %v521_v16  ;;  %v577_v20 = vld [vmem:[%s681_s19] sm:$0xff]  ;;  %v576_v22 = vld [vmem:[%s220_s26 + $0x4] sm:$0x10] }
  0x15   : > { %367 = vmatpush.bf16.msra.mxu0 %v583_v2  ;;  %v519_v21 = vld [vmem:[%s220_s26] sm:$0xf] }
  0x16   : > { %v364_v8 = vsel %vm362_vm0, %v346_v5, 0  ;;  %v520_v23 = vor.u32 %v576_v22, %v519_v21 }
  0x17   : > { %384 = vmatpush.bf16.msra.mxu1 %v364_v8 }
  0x18   : > { %277 = vperm.xlu0 %614, %v269_v11  }
  0x19   : > { %368 = vmatpush.bf16.msra.mxu0 %v582_v7 }
  0x1b   : > { %385 = vmatpush.bf16.msra.mxu1 %v587_v9 }
  0x1d   : > { %369 = vmatpush.bf16.msra.mxu0 %v581_v10 }
  0x1f   : > { %386 = vmatpush.bf16.msra.mxu1 %v586_v12 }
  0x21   : > { %370 = vmatpush.bf16.msra.mxu0 %v580_v13 }
  0x23   : > { %387 = vmatpush.bf16.msra.mxu1 %v585_v14 }
  0x25   : > { %371 = vmatpush.bf16.msra.mxu0 %v579_v17 }
  0x26   : > { %569 = vmatmul.msk.bf16.vlgmr.msra.gmra.mxu1 %vm358_vm1, %v524_v18 }
  0x29   : > { %372 = vmatpush.bf16.msra.mxu0 %v578_v19 }
  0x2d   : > { %373 = vmatpush.bf16.msra.mxu0 %v577_v20 }
  0x30   : > { %374 = vmatmul.bf16.vlgmr.msra.gmra.mxu0 %v520_v23 }
  0x82   : > { %v273_v24 = vpop.permute.xlu0 %272 }
  0x8a   : > { %v278_v30 = vpop.permute.xlu0 %277 }
  0xa3   : > { %v389_v25 = vpop.f32.mrf.mxu1 }
  0xab   : > { %v391_v33 = vpop.f32.mrf.mxu1 }
  0xad   : > { %v375_v26 = vpop.f32.mrf.mxu0 }
  0xae   : > { %v376_v27 = vadd.f32 %v375_v26, %v273_v24 }
  0xb0   : > { %v390_v28 = vadd.f32 %v389_v25, %v376_v27 }
  0xb2   : > { %v394_v29 = vmax.f32 %v390_v28, 0.0 }
  0xb4   : > { %396 = vst [vmem:[%s241_s29] sm:$0xff] %v394_v29 }
  0xb5   : > { %v377_v31 = vpop.f32.mrf.mxu0 }
  0xb6   : > { %v378_v32 = vadd.f32 %v377_v31, %v278_v30 }
  0xb8   : > { %v392_v34 = vadd.f32 %v391_v33, %v378_v32 }
  0xba   : > { %v395_v35 = vmax.f32 %v392_v34, 0.0 }
  0xbc   : > { %397 = vst [vmem:[%s241_s29 + $0x8] sm:$0x3] %v395_v35 }
  0xbd PF: > { %s13_s14 = sadd.s32 1, %s637_s14   ;;  %s722_s12 = smov %s633_s13 }
  0xbe   : > { %p10_p5 = scmp.ge.s32.totalorder %s13_s14, 4   ;;  %s723_s13 = smov %s725_s15 }
  0xc0   :  { %12 = sbr.rel (!%p10_p5) target bundleno = 2 (0x2), region = 68 }

// kernel: networks_forward.11
= control target key start
LH: loop header
LB: loop body
LE: loop exit
PB: predicated region body
PF: predicated region fallthrough
CT: control target
= control target key end

     0   :  { %s527_s12 = smov 0   ;;  %s529_s13 = smov 0   ;;  %s575_s0 = inlined_call_operand.vmem [shape: bf16[2,4,90], index: 0, kind: input, shape index: {}]   ;;  %s576_s1 = inlined_call_operand.vmem [shape: bf16[2,90,128], index: 1, kind: input, shape index: {}]   ;;  %s577_s2 = inlined_call_operand.vmem [shape: f32[2,4,1], index: 2, kind: input, shape index: {}]   ;;  %s578_s3 = inlined_call_operand.vmem [shape: f32[2,4,128], index: 3, kind: output, shape index: {}]  }
   0x1   :  { %s531_s14 = smov 0  }
   0x2 LB: > { %s25_s15 = sadd.s32 1, %s500_s13  ;;  %p417_p0 = scmp.ge.s32.totalorder %s504_s14, 1  ;;  %s504_s14 = sphi %s531_s14, %s13_s14   ;;  %s500_s13 = sphi %s529_s13, %s580_s13   ;;  %s496_s12 = sphi %s527_s12, %s579_s12  }
   0x3   : > { %p27_p1 = scmp.ge.s32.totalorder %s25_s15, 2  ;;  %p174_p2 = scmp.lt.s32.totalorder %s504_s14, 3 }
   0x5   : > { %s582_s15 = smov (%p27_p1, %s25_s15), 0  ;;  %p175_p3 = pnand %p417_p0, %p174_p2 }
   0x6   : > { %p211_p4 = scmp.lt.s32.totalorder (!%p175_p3), %s496_s12, 1 }
   0x7   : > { %178 = sbr.rel (%p175_p3) target bundleno = 177 (0xb1), region = 32 }
   0xc   : > { %s584_s12 = smov (!%p211_p4, %s496_s12), 1  ;;  %v506_v0 = vmov 0   ;;  %vm293_vm0 = vcmask 1044480   ;;  %vm289_vm1 = vcmask 736256  }
   0xd   : > { %481 = vset.pattern.permute.xlu0 %v506_v0  ;;  %s455_s16 = smul.u32 48, %s584_s12  ;;  %s420_s17 = sshll.u32 %s584_s12, 2 }
   0xe   : > { %s226_s23 = scalar_lea.vmem %s577_s2, %s420_s17  ;;  %s418_s24 = sshll.u32 %s584_s12, 1 }
   0xf   : > { %s222_s20 = scalar_lea.vmem %s576_s1, %s455_s16  ;;  %v248_v4 = vld [vmem:[%s226_s23] sm:$0xf]  ;;  %s214_s27 = scalar_lea.vmem %s575_s0, %s418_s24 }
  0x10   : > { %v444_v1 = vld [vmem:[%s222_s20 + $0x28] sm:$0xf]  ;;  %v454_v2 = vld [vmem:[%s222_s20 + $0x28] sm:$0x10]  ;;  %251 = vperm.xlu0 %481, %v248_v4   ;;  %v453_v6 = vld [vmem:[%s222_s20 + $0x20] sm:$0xff]  ;;  %s233_s30 = scalar_lea.vmem %s578_s3, %s420_s17 }
  0x11   : > { %v445_v3 = vor.u32 %v454_v2, %v444_v1  ;;  %v452_v7 = vld [vmem:[%s222_s20 + $0x18] sm:$0xff]  ;;  %v451_v8 = vld [vmem:[%s222_s20 + $0x10] sm:$0xff]  ;;  %v450_v9 = vld [vmem:[%s222_s20 + $0x8] sm:$0xff] }
  0x12   : > { %v449_v10 = vld [vmem:[%s222_s20] sm:$0xff] }
  0x13   : > { %v295_v5 = vsel %vm293_vm0, %v445_v3, 0  ;;  %v235_v11 = vld [vmem:[%s214_s27] sm:$0x3] }
  0x14   : > { %299 = vmatpush.bf16.msra.mxu0 %v295_v5 }
  0x18   : > { %300 = vmatpush.bf16.msra.mxu0 %v453_v6 }
  0x1c   : > { %301 = vmatpush.bf16.msra.mxu0 %v452_v7 }
  0x20   : > { %302 = vmatpush.bf16.msra.mxu0 %v451_v8 }
  0x24   : > { %303 = vmatpush.bf16.msra.mxu0 %v450_v9 }
  0x28   : > { %304 = vmatpush.bf16.msra.mxu0 %v449_v10 }
  0x2b   : > { %446 = vmatmul.msk.bf16.vlgmr.msra.gmra.mxu0 %vm289_vm1, %v235_v11 }
  0x82   : > { %v252_v12 = vpop.permute.xlu0 %251 }
  0xa8   : > { %v306_v13 = vpop.f32.mrf.mxu0 }
  0xa9   : > { %v307_v14 = vadd.f32 %v306_v13, %v252_v12 }
  0xab   : > { %v310_v15 = vmax.f32 %v307_v14, 0.0 }
  0xad   : > { %311 = vst [vmem:[%s233_s30] sm:$0xf] %v310_v15 }
  0xb0   : > { %v308_v16 = vpop.f32.mrf.mxu0 }
  0xb1 PF: > { %s13_s14 = sadd.s32 1, %s504_s14   ;;  %s579_s12 = smov %s500_s13 }
  0xb2   : > { %p10_p5 = scmp.ge.s32.totalorder %s13_s14, 4   ;;  %s580_s13 = smov %s582_s15 }
  0xb4   :  { %12 = sbr.rel (!%p10_p5) target bundleno = 2 (0x2), region = 68 }

// kernel: squeeze.66
= control target key start
LH: loop header
LB: loop body
LE: loop exit
PB: predicated region body
PF: predicated region fallthrough
CT: control target
= control target key end

     0   :  { %vm5_vm0 = vcmask 1047556   ;;  %s445_s14 = smov 14   ;;  %s446_s27 = smov 12   ;;  %s706_s0 = inlined_call_operand.vmem [shape: f32[1,1,2,8,2,8,2], index: 0, kind: input, shape index: {}]   ;;  %s707_s1 = inlined_call_operand.hbm [shape: f32[2,1,16,16], index: 1, kind: output, shape index: {}]  }
   0x1   :  { %v355_v0 = vld [vmem:[%s706_s0 + $0x7] ss:$8 sm:$0xf]   ;;  %v363_v11 = vld [vmem:[%s706_s0 + $0x6] ss:$8 sm:$0xf]  }
   0x2   :  { %v356_v1 = vld [vmem:[%s706_s0 + $0x7] ss:$8 sm:$0xf0]   ;;  %v364_v12 = vld [vmem:[%s706_s0 + $0x6] ss:$8 sm:$0xf0]  }
   0x3   :  { %v359_v2 = vld [vmem:[%s706_s0 + $0x87] ss:$8 sm:$0xf]   ;;  %v41_v3 = vsel %vm5_vm0, %v356_v1, %v355_v0  ;;  %v84_v14 = vsel %vm5_vm0, %v364_v12, %v363_v11  ;;  %v365_v15 = vld [vmem:[%s706_s0 + $0x46] ss:$8 sm:$0xf]  }
   0x4   :  { %v360_v4 = vld [vmem:[%s706_s0 + $0x87] ss:$8 sm:$0xf0]   ;;  %42 = vrot.lane.b32.xlu0 %v41_v3, %s445_s14  ;;  %85 = vrot.lane.b32.xlu2 %v84_v14, %s446_s27  ;;  %v366_v16 = vld [vmem:[%s706_s0 + $0x46] ss:$8 sm:$0xf0]  }
   0x5   :  { %v62_v5 = vsel %vm5_vm0, %v360_v4, %v359_v2  ;;  %v357_v6 = vld [vmem:[%s706_s0 + $0x47] ss:$8 sm:$0xf]   ;;  %v367_v17 = vld [vmem:[%s706_s0 + $0x86] ss:$8 sm:$0xf]   ;;  %v94_v21 = vsel %vm5_vm0, %v366_v16, %v365_v15 }
   0x6   :  { %63 = vrot.lane.b32.xlu1 %v62_v5, %s445_s14  ;;  %v358_v7 = vld [vmem:[%s706_s0 + $0x47] ss:$8 sm:$0xf0]   ;;  %v368_v18 = vld [vmem:[%s706_s0 + $0x86] ss:$8 sm:$0xf0]  }
   0x7   :  { %v361_v8 = vld [vmem:[%s706_s0 + $0xc7] ss:$8 sm:$0xf]   ;;  %v51_v10 = vsel %vm5_vm0, %v358_v7, %v357_v6  ;;  %v369_v19 = vld [vmem:[%s706_s0 + $0xc6] ss:$8 sm:$0xf]   ;;  %v105_v22 = vsel %vm5_vm0, %v368_v18, %v367_v17 }
   0x8   :  { %v362_v9 = vld [vmem:[%s706_s0 + $0xc7] ss:$8 sm:$0xf0]   ;;  %v370_v20 = vld [vmem:[%s706_s0 + $0xc6] ss:$8 sm:$0xf0]  }
   0x9   :  { %v73_v13 = vsel %vm5_vm0, %v362_v9, %v361_v8  ;;  %v116_v23 = vsel %vm5_vm0, %v370_v20, %v369_v19 }
   0xc   :  { %52 = vrot.lane.b32.xlu0 %v51_v10, %s445_s14 }
   0xe   :  { %74 = vrot.lane.b32.xlu1 %v73_v13, %s445_s14 }
   0xf   :  { %2 = vsyncpa [#allocation1], 0  ;;  %95 = vrot.lane.b32.xlu2 %v94_v21, %s446_s27  ;;  %v371_v24 = vld [vmem:[%s706_s0 + $0x5] ss:$8 sm:$0xf]   ;;  %s447_s23 = smov 10  }
  0x10   :  { %v372_v25 = vld [vmem:[%s706_s0 + $0x5] ss:$8 sm:$0xf0]   ;;  %v379_v35 = vld [vmem:[%s706_s0 + $0x4] ss:$8 sm:$0xf]  }
  0x11   :  { %v373_v26 = vld [vmem:[%s706_s0 + $0x45] ss:$8 sm:$0xf]   ;;  %v127_v30 = vsel %vm5_vm0, %v372_v25, %v371_v24  ;;  %v380_v36 = vld [vmem:[%s706_s0 + $0x4] ss:$8 sm:$0xf0]  }
  0x12   :  { %v374_v27 = vld [vmem:[%s706_s0 + $0x45] ss:$8 sm:$0xf0]   ;;  %v381_v37 = vld [vmem:[%s706_s0 + $0x44] ss:$8 sm:$0xf]   ;;  %v170_v40 = vsel %vm5_vm0, %v380_v36, %v379_v35 }
  0x13   :  { %v375_v28 = vld [vmem:[%s706_s0 + $0x85] ss:$8 sm:$0xf]   ;;  %v137_v31 = vsel %vm5_vm0, %v374_v27, %v373_v26  ;;  %v382_v38 = vld [vmem:[%s706_s0 + $0x44] ss:$8 sm:$0xf0]  }
  0x14   :  { %106 = vrot.lane.b32.xlu0 %v105_v22, %s446_s27  ;;  %v376_v29 = vld [vmem:[%s706_s0 + $0x85] ss:$8 sm:$0xf0]   ;;  %v180_v41 = vsel %vm5_vm0, %v382_v38, %v381_v37  ;;  %s448_s7 = smov 8   ;;  %s449_s20 = smov 6   ;;  %vm7_vm1 = vcmask 15360  }
  0x15   :  { %v148_v32 = vsel %vm5_vm0, %v376_v29, %v375_v28  ;;  %v377_v33 = vld [vmem:[%s706_s0 + $0xc5] ss:$8 sm:$0xf]   ;;  %v383_v42 = vld [vmem:[%s706_s0 + $0x84] ss:$8 sm:$0xf]  }
  0x16   :  { %117 = vrot.lane.b32.xlu1 %v116_v23, %s446_s27  ;;  %v378_v34 = vld [vmem:[%s706_s0 + $0xc5] ss:$8 sm:$0xf0]   ;;  %v384_v43 = vld [vmem:[%s706_s0 + $0x84] ss:$8 sm:$0xf0]  }
  0x17   :  { %128 = vrot.lane.b32.xlu2 %v127_v30, %s447_s23  ;;  %v159_v39 = vsel %vm5_vm0, %v378_v34, %v377_v33  ;;  %v385_v44 = vld [vmem:[%s706_s0 + $0xc4] ss:$8 sm:$0xf]   ;;  %v387_v46 = vld [vmem:[%s706_s0 + $0x3] ss:$8 sm:$0xf]   ;;  %v191_v48 = vsel %vm5_vm0, %v384_v43, %v383_v42 }
  0x18   :  { %v386_v45 = vld [vmem:[%s706_s0 + $0xc4] ss:$8 sm:$0xf0]   ;;  %v388_v47 = vld [vmem:[%s706_s0 + $0x3] ss:$8 sm:$0xf0]  }
  0x19   :  { %v202_v49 = vsel %vm5_vm0, %v386_v45, %v385_v44  ;;  %v213_v50 = vsel %vm5_vm0, %v388_v47, %v387_v46  ;;  %v389_v51 = vld [vmem:[%s706_s0 + $0x43] ss:$8 sm:$0xf]   ;;  %v395_v60 = vld [vmem:[%s706_s0 + $0x2] ss:$8 sm:$0xf]  }
  0x1a   :  { %v390_v52 = vld [vmem:[%s706_s0 + $0x43] ss:$8 sm:$0xf0]   ;;  %v396_v61 = vld [vmem:[%s706_s0 + $0x2] ss:$8 sm:$0xf0]  }
  0x1b   :  { %v391_v53 = vld [vmem:[%s706_s0 + $0x83] ss:$8 sm:$0xf]   ;;  %v223_v57 = vsel %vm5_vm0, %v390_v52, %v389_v51  ;;  %v397_v62 = vld [vmem:[%s706_s0 + $0x42] ss:$8 sm:$0xf]   ;;  %v256_v2 = vsel %vm5_vm0, %v396_v61, %v395_v60 }
  0x1c   :  { %138 = vrot.lane.b32.xlu0 %v137_v31, %s447_s23  ;;  %v392_v54 = vld [vmem:[%s706_s0 + $0x83] ss:$8 sm:$0xf0]   ;;  %v398_v63 = vld [vmem:[%s706_s0 + $0x42] ss:$8 sm:$0xf0]  }
  0x1d   :  { %v393_v55 = vld [vmem:[%s706_s0 + $0xc3] ss:$8 sm:$0xf]   ;;  %v234_v58 = vsel %vm5_vm0, %v392_v54, %v391_v53  ;;  %v399_v0 = vld [vmem:[%s706_s0 + $0x82] ss:$8 sm:$0xf]   ;;  %v266_v3 = vsel %vm5_vm0, %v398_v63, %v397_v62 }
  0x1e   :  { %149 = vrot.lane.b32.xlu1 %v148_v32, %s447_s23  ;;  %v394_v56 = vld [vmem:[%s706_s0 + $0xc3] ss:$8 sm:$0xf0]   ;;  %v400_v1 = vld [vmem:[%s706_s0 + $0x82] ss:$8 sm:$0xf0]  }
  0x1f   :  { %160 = vrot.lane.b32.xlu2 %v159_v39, %s447_s23  ;;  %v245_v59 = vsel %vm5_vm0, %v394_v56, %v393_v55  ;;  %v277_v4 = vsel %vm5_vm0, %v400_v1, %v399_v0  ;;  %s450_s16 = smov 4   ;;  %v401_v5 = vld [vmem:[%s706_s0 + $0xc2] ss:$8 sm:$0xf]   ;;  %s451_s29 = smov 2   ;;  %vm44_vm2 = vcmask 130160  }
  0x20   :  { %v402_v6 = vld [vmem:[%s706_s0 + $0xc2] ss:$8 sm:$0xf0]   ;;  %v403_v7 = vld [vmem:[%s706_s0 + $0x1] ss:$8 sm:$0xf]  }
  0x21   :  { %v404_v8 = vld [vmem:[%s706_s0 + $0x1] ss:$8 sm:$0xf0]   ;;  %v288_v11 = vsel %vm5_vm0, %v402_v6, %v401_v5  ;;  %v3_v20 = vld [vmem:[%s706_s0] ss:$8 sm:$0xf]  }
  0x22   :  { %v405_v9 = vld [vmem:[%s706_s0 + $0x41] ss:$8 sm:$0xf]   ;;  %v299_v12 = vsel %vm5_vm0, %v404_v8, %v403_v7  ;;  %v4_v21 = vld [vmem:[%s706_s0] ss:$8 sm:$0xf0]  }
  0x23   :  { %v406_v10 = vld [vmem:[%s706_s0 + $0x41] ss:$8 sm:$0xf0]   ;;  %v6_v22 = vsel %vm5_vm0, %v4_v21, %v3_v20  ;;  %v351_v23 = vld [vmem:[%s706_s0 + $0x80] ss:$8 sm:$0xf]  }
  0x24   :  { %171 = vrot.lane.b32.xlu0 %v170_v40, %s448_s7  ;;  %v309_v13 = vsel %vm5_vm0, %v406_v10, %v405_v9  ;;  %v407_v14 = vld [vmem:[%s706_s0 + $0x81] ss:$8 sm:$0xf]   ;;  %8 = vst.msk [vmem:[#allocation0] sm:$0xff] %vm7_vm1, %v6_v22   ;;  %vm87_vm3 = vcmask 113760   ;;  %vm130_vm4 = vcmask 97360  }
  0x25   :  { %v408_v15 = vld [vmem:[%s706_s0 + $0x81] ss:$8 sm:$0xf0]   ;;  %v352_v24 = vld [vmem:[%s706_s0 + $0x80] ss:$8 sm:$0xf0]  }
  0x26   :  { %181 = vrot.lane.b32.xlu1 %v180_v41, %s448_s7  ;;  %v409_v16 = vld [vmem:[%s706_s0 + $0xc1] ss:$8 sm:$0xf]   ;;  %v320_v18 = vsel %vm5_vm0, %v408_v15, %v407_v14  ;;  %v23_v25 = vsel %vm5_vm0, %v352_v24, %v351_v23  ;;  %v349_v26 = vld [vmem:[%s706_s0 + $0x40] ss:$8 sm:$0xf]  }
  0x27   :  { %192 = vrot.lane.b32.xlu2 %v191_v48, %s448_s7  ;;  %v410_v17 = vld [vmem:[%s706_s0 + $0xc1] ss:$8 sm:$0xf0]   ;;  %26 = vst.msk [vmem:[#allocation0 + $0x10] sm:$0xff] %vm7_vm1, %v23_v25   ;;  %vm173_vm5 = vcmask 80960   ;;  %vm216_vm6 = vcmask 64560  }
  0x28   :  { %v331_v19 = vsel %vm5_vm0, %v410_v17, %v409_v16  ;;  %v350_v27 = vld [vmem:[%s706_s0 + $0x40] ss:$8 sm:$0xf0]   ;;  %vm259_vm7 = vcmask 48160   ;;  %vm302_vm8 = vcmask 31760   ;;  %s342_s1 = sshll.u32 %s707_s1, 4  ;;  %s343_s1 = int_to_ptr.hbm [resolvable:$true] %s342_s1 }
  0x29   :  { %v14_v28 = vsel %vm5_vm0, %v350_v27, %v349_v26  ;;  %v353_v29 = vld [vmem:[%s706_s0 + $0xc0] ss:$8 sm:$0xf]  }
  0x2a   :  { %17 = vst.msk [vmem:[#allocation0 + $0x8] sm:$0xff] %vm7_vm1, %v14_v28   ;;  %v354_v30 = vld [vmem:[%s706_s0 + $0xc0] ss:$8 sm:$0xf0]   ;;  %s452_s0 = smov [#allocation0]  }
  0x2b   :  { %v32_v31 = vsel %vm5_vm0, %v354_v30, %v353_v29  ;;  %s340_s25 = sshll.u32 %s452_s0, 4  ;;  %s341_s25 = int_to_ptr.vmem [resolvable:$true] %s340_s25 }
  0x2c   :  { %203 = vrot.lane.b32.xlu0 %v202_v49, %s448_s7  ;;  %35 = vst.msk [vmem:[#allocation0 + $0x18] sm:$0xff] %vm7_vm1, %v32_v31  }
  0x2e   :  { %214 = vrot.lane.b32.xlu1 %v213_v50, %s449_s20 }
  0x2f   :  { %224 = vrot.lane.b32.xlu2 %v223_v57, %s449_s20 }
  0x34   :  { %235 = vrot.lane.b32.xlu0 %v234_v58, %s449_s20 }
  0x36   :  { %246 = vrot.lane.b32.xlu1 %v245_v59, %s449_s20 }
  0x37   :  { %257 = vrot.lane.b32.xlu2 %v256_v2, %s450_s16 }
  0x3c   :  { %267 = vrot.lane.b32.xlu0 %v266_v3, %s450_s16 }
  0x3e   :  { %278 = vrot.lane.b32.xlu1 %v277_v4, %s450_s16 }
  0x3f   :  { %289 = vrot.lane.b32.xlu2 %v288_v11, %s450_s16 }
  0x44   :  { %300 = vrot.lane.b32.xlu0 %v299_v12, %s451_s29 }
  0x46   :  { %310 = vrot.lane.b32.xlu1 %v309_v13, %s451_s29 }
  0x47   :  { %321 = vrot.lane.b32.xlu2 %v320_v18, %s451_s29 }
  0x4c   :  { %332 = vrot.lane.b32.xlu0 %v331_v19, %s451_s29 }
  0x5e   :  { %v86_v32 = vpop.permute.xlu2 %85  }
  0x69   :  { %v96_v33 = vpop.permute.xlu2 %95  }
  0x71   :  { %v129_v34 = vpop.permute.xlu2 %128  }
  0x76   :  { %v43_v35 = vpop.permute.xlu0 %42  }
  0x77   :  { %45 = vst.msk [vmem:[#allocation0] sm:$0xff] %vm44_vm2, %v43_v35  }
  0x78   :  { %v64_v36 = vpop.permute.xlu1 %63   ;;  %88 = vst.msk [vmem:[#allocation0] sm:$0xff] %vm87_vm3, %v86_v32  }
  0x79   :  { %67 = vst.msk [vmem:[#allocation0 + $0x10] sm:$0xff] %vm44_vm2, %v64_v36   ;;  %v161_v37 = vpop.permute.xlu2 %160  }
  0x7a   :  { %131 = vst.msk [vmem:[#allocation0] sm:$0xff] %vm130_vm4, %v129_v34  }
  0x7e   :  { %v53_v38 = vpop.permute.xlu0 %52  }
  0x7f   :  { %56 = vst.msk [vmem:[#allocation0 + $0x8] sm:$0xff] %vm44_vm2, %v53_v38  }
  0x80   :  { %v75_v39 = vpop.permute.xlu1 %74   ;;  %99 = vst.msk [vmem:[#allocation0 + $0x8] sm:$0xff] %vm87_vm3, %v96_v33  }
  0x81   :  { %78 = vst.msk [vmem:[#allocation0 + $0x18] sm:$0xff] %vm44_vm2, %v75_v39   ;;  %v193_v40 = vpop.permute.xlu2 %192  }
  0x86   :  { %v107_v41 = vpop.permute.xlu0 %106  }
  0x87   :  { %110 = vst.msk [vmem:[#allocation0 + $0x10] sm:$0xff] %vm87_vm3, %v107_v41  }
  0x88   :  { %v118_v42 = vpop.permute.xlu1 %117  }
  0x89   :  { %121 = vst.msk [vmem:[#allocation0 + $0x18] sm:$0xff] %vm87_vm3, %v118_v42   ;;  %v225_v43 = vpop.permute.xlu2 %224  }
  0x8a   :  { %164 = vst.msk [vmem:[#allocation0 + $0x18] sm:$0xff] %vm130_vm4, %v161_v37  }
  0x8e   :  { %v139_v44 = vpop.permute.xlu0 %138  }
  0x8f   :  { %142 = vst.msk [vmem:[#allocation0 + $0x8] sm:$0xff] %vm130_vm4, %v139_v44  }
  0x90   :  { %v150_v45 = vpop.permute.xlu1 %149  }
  0x91   :  { %153 = vst.msk [vmem:[#allocation0 + $0x10] sm:$0xff] %vm130_vm4, %v150_v45   ;;  %v258_v46 = vpop.permute.xlu2 %257  }
  0x92   :  { %196 = vst.msk [vmem:[#allocation0 + $0x10] sm:$0xff] %vm173_vm5, %v193_v40  }
  0x96   :  { %v172_v47 = vpop.permute.xlu0 %171  }
  0x97   :  { %174 = vst.msk [vmem:[#allocation0] sm:$0xff] %vm173_vm5, %v172_v47  }
  0x98   :  { %v182_v48 = vpop.permute.xlu1 %181  }
  0x99   :  { %185 = vst.msk [vmem:[#allocation0 + $0x8] sm:$0xff] %vm173_vm5, %v182_v48   ;;  %v290_v49 = vpop.permute.xlu2 %289  }
  0x9a   :  { %228 = vst.msk [vmem:[#allocation0 + $0x8] sm:$0xff] %vm216_vm6, %v225_v43  }
  0x9e   :  { %v204_v50 = vpop.permute.xlu0 %203  }
  0x9f   :  { %207 = vst.msk [vmem:[#allocation0 + $0x18] sm:$0xff] %vm173_vm5, %v204_v50  }
  0xa0   :  { %v215_v51 = vpop.permute.xlu1 %214  }
  0xa1   :  { %217 = vst.msk [vmem:[#allocation0] sm:$0xff] %vm216_vm6, %v215_v51   ;;  %v322_v52 = vpop.permute.xlu2 %321  }
  0xa2   :  { %260 = vst.msk [vmem:[#allocation0] sm:$0xff] %vm259_vm7, %v258_v46  }
  0xa6   :  { %v236_v53 = vpop.permute.xlu0 %235  }
  0xa7   :  { %239 = vst.msk [vmem:[#allocation0 + $0x10] sm:$0xff] %vm216_vm6, %v236_v53  }
  0xa8   :  { %v247_v54 = vpop.permute.xlu1 %246  }
  0xa9   :  { %250 = vst.msk [vmem:[#allocation0 + $0x18] sm:$0xff] %vm216_vm6, %v247_v54  }
  0xaa   :  { %293 = vst.msk [vmem:[#allocation0 + $0x18] sm:$0xff] %vm259_vm7, %v290_v49  }
  0xae   :  { %v268_v55 = vpop.permute.xlu0 %267  }
  0xaf   :  { %271 = vst.msk [vmem:[#allocation0 + $0x8] sm:$0xff] %vm259_vm7, %v268_v55  }
  0xb0   :  { %v279_v56 = vpop.permute.xlu1 %278  }
  0xb1   :  { %282 = vst.msk [vmem:[#allocation0 + $0x10] sm:$0xff] %vm259_vm7, %v279_v56  }
  0xb2   :  { %325 = vst.msk [vmem:[#allocation0 + $0x10] sm:$0xff] %vm302_vm8, %v322_v52  }
  0xb6   :  { %v301_v57 = vpop.permute.xlu0 %300  }
  0xb7   :  { %303 = vst.msk [vmem:[#allocation0] sm:$0xff] %vm302_vm8, %v301_v57  }
  0xb8   :  { %v311_v58 = vpop.permute.xlu1 %310  }
  0xb9   :  { %314 = vst.msk [vmem:[#allocation0 + $0x8] sm:$0xff] %vm302_vm8, %v311_v58  }
  0xbe   :  { %v333_v59 = vpop.permute.xlu0 %332  }
  0xbf   :  { %336 = vst.msk [vmem:[#allocation0 + $0x18] sm:$0xff] %vm302_vm8, %v333_v59  }
  0xc0   :  { %345 = dma.vmem_to_hbm [thread:$0]  %s341_s25, 512, %s343_s1, [#allocation1]  }
  0xc1   :  { %443 = dma.done.wait [#allocation1], 512  }
  0xc2   :  { %444 = vsyncadd [#allocation1], 4294966784 }
  0xc3   :  { %348 = vsyncpa [#allocation1], 1 }

</bundles_post_ra>
